<compile_context>
chip_gen: v5e
topology: v5e:2x2
jax: 0.10.0
libtpu: 0.0.40
codegen_flags: <defaults>
</compile_context>

<pallas_src>
import math

import numpy as np
import jax
import jax.numpy as jnp
from jax.experimental import pallas as pl
from jax.experimental.pallas import tpu as pltpu

PHI = (1.0 + math.sqrt(5.0)) / 2.0  # golden ratio

_TB = 8          # batch tile (sublane-aligned)
_BR_REAL = 784   # 256 + 256 + 256 + 16 fused branch width
_BR_PAD = 896    # padded to a multiple of 128 lanes
_OUT_W = 128     # lane-dense output width


# ----------------------------------------------------------------------------
# Kernel
# ----------------------------------------------------------------------------
def _qm_expert_kernel(
    x_ref,                        # [TB, E]               f32
    w1_ref, b1_ref,               # encoder L1: [E, H]    bf16 / [1, H] f32
    w2_ref, b2_ref,               # encoder L2: [H, H2]   bf16 / [1, H2] f32
    wbr_ref, bbr_ref,             # fused branch L1: [H2, 896] bf16 / [1, 896] f32
    wwf2_ref, bwf2_ref,           # wavefunction L2: [256, 128]
    wm2_ref, bm2_ref,             # measurement  L2: [256, 64]
    we2_ref, be2_ref,             # entanglement L2: [256, 32]
    whwf_ref, whm_ref,            # head weights, per segment, padded to 128 out lanes
    whe_ref, whc_ref,             #   [128,128], [64,128], [32,128], [128,128] bf16
    bh_ref,                       # [1, 128] f32 (cols 0..2 valid)
    out_ref,                      # [TB, 128] f32
):
    f32 = jnp.float32
    bf16 = jnp.bfloat16

    def bdot(a, w_ref):
        # bf16 x bf16 MXU matmul with f32 accumulation.
        return jnp.dot(a.astype(bf16), w_ref[...], preferred_element_type=f32)

    x = x_ref[...]

    # quantum_encoder: Linear -> Tanh -> Dropout(eval: identity) -> Linear -> Tanh
    h = jnp.tanh(bdot(x, w1_ref) + b1_ref[...])
    q = jnp.tanh(bdot(h, w2_ref) + b2_ref[...])

    # fused first layers of all four branches (one MXU pass over q)
    fused = bdot(q, wbr_ref) + bbr_ref[...]          # [TB, 896]
    wf_h = fused[:, 0:256]                           # wavefunction pre-act
    m_h = jnp.maximum(fused[:, 256:512], 0.0)        # measurement ReLU
    e_h = jnp.tanh(fused[:, 512:768])                # entanglement Tanh
    coh = fused[:, 768:896]                          # coherence (cols >=16 exact zeros)

    # wavefunction_analyzer: (Complex: identity) -> Linear -> Sigmoid
    wf = jax.nn.sigmoid(bdot(wf_h, wwf2_ref) + bwf2_ref[...])      # [TB, 128]

    # measurement_detector: Linear -> Softmax(dim=-1)
    m_logits = bdot(m_h, wm2_ref) + bm2_ref[...]                   # [TB, 64]
    m_z = m_logits - jnp.max(m_logits, axis=-1, keepdims=True)
    m_e = jnp.exp(m_z)
    meas = m_e / jnp.sum(m_e, axis=-1, keepdims=True)

    # entanglement_analyzer second Linear
    ent = bdot(e_h, we2_ref) + be2_ref[...]                        # [TB, 32]

    # three heads over combined [wf|meas|ent|coh]: four dots instead of a
    # lane-concatenate of non-128-aligned segments.
    head = (bdot(wf, whwf_ref) + bdot(meas, whm_ref)
            + bdot(ent, whe_ref) + bdot(coh, whc_ref) + bh_ref[...])  # [TB, 128]
    # head cols 0..2 = (validity, unity, uncertainty) logits; cols 3..127 = 0.

    wf_mean = jnp.mean(wf, axis=-1, keepdims=True)    # [TB, 1]
    ent_mean = jnp.mean(ent, axis=-1, keepdims=True)  # [TB, 1]

    lane = jax.lax.broadcasted_iota(jnp.int32, (1, _OUT_W), 1)
    out = (head
           + jnp.where(lane == 3, wf_mean, 0.0)
           + jnp.where(lane == 4, ent_mean, 0.0))
    out_ref[...] = out


# ----------------------------------------------------------------------------
# Wrapper: batched pallas_call, weights resident across the batch grid
# ----------------------------------------------------------------------------
def _args_from_params(x, params):
    return (
        x,
        params["w1"], params["b1"],
        params["w2"], params["b2"],
        params["w_br"], params["b_br"],
        params["wwf2"], params["bwf2"],
        params["wm2"], params["bm2"],
        params["we2"], params["be2"],
        params["wh_wf"], params["wh_m"], params["wh_e"], params["wh_c"],
        params["bh"],
    )


@jax.jit
def qm_expert_forward_raw(x, params):
    """Runs the Pallas kernel over the full batch; returns [B, 128] raw rows.

    Row layout: [v_logit, u_logit, unc_logit, wf_mean, ent_mean, 0...0]
    (cols 5..127 are zero padding for a lane-dense store; unused downstream).
    """
    B, E = x.shape
    b_pad = ((B + _TB - 1) // _TB) * _TB
    if b_pad != B:
        x = jnp.pad(x, ((0, b_pad - B), (0, 0)))

    args = _args_from_params(x, params)
    grid = (b_pad // _TB,)

    in_specs = [pl.BlockSpec((_TB, E), lambda b: (b, 0))]
    # Weights/biases: full-array blocks with a constant index_map -> they are
    # DMA'd once and stay VMEM-resident across the batch grid.
    in_specs += [pl.BlockSpec(a.shape, lambda b: (0, 0)) for a in args[1:]]

    out = pl.pallas_call(
        _qm_expert_kernel,
        out_shape=jax.ShapeDtypeStruct((b_pad, _OUT_W), jnp.float32),
        grid=grid,
        in_specs=in_specs,
        out_specs=pl.BlockSpec((_TB, _OUT_W), lambda b: (b, 0)),
        compiler_params=pltpu.CompilerParams(
            dimension_semantics=("parallel",),
        ),
    )(*args)
    return out[:B]


@jax.jit
def _postprocess(raw):
    """On-device scalar post-processing -> [B, 5] scores.

    Columns: validity_confidence, unity_confidence, phi_resonance_score,
             consciousness_score, uncertainty_estimate (already clamped).
    """
    validity = jnp.clip(jax.nn.sigmoid(raw[:, 0] / PHI), 0.0, 1.0)
    unity = jnp.clip(jax.nn.sigmoid(raw[:, 1] * PHI), 0.0, 1.0)
    uncertainty = jnp.clip(jax.nn.sigmoid(raw[:, 2]), 0.0, 1.0)
    phi_res = jnp.clip(raw[:, 3], 0.0, 1.0)
    consciousness = jnp.maximum(raw[:, 4] * PHI, 0.0)
    return jnp.stack([validity, unity, phi_res, consciousness, uncertainty], axis=-1)


def qm_expert_predict_batch(x, params):
    """Full forward semantics for a whole batch with ONE host transfer."""
    raw = qm_expert_forward_raw(x, params)
    scores = jax.device_get(_postprocess(raw))   # single device->host sync per batch
    preds = []
    for row in scores:
        validity, unity, phi_res, consciousness, uncertainty = (float(v) for v in row)
        mathematical_errors = []
        if validity < 0.8:
            mathematical_errors.append("Insufficient quantum mechanical rigor")
        if unity < 0.9:
            mathematical_errors.append("Weak quantum unity collapse probability")
        if consciousness < 0.5:
            mathematical_errors.append("Inadequate quantum consciousness integration")
        improvement_suggestions = []
        if phi_res < 0.6:
            improvement_suggestions.append("Enhance phi-harmonic quantum frequencies")
        if uncertainty > 0.2:
            improvement_suggestions.append("Reduce quantum measurement uncertainty")
        preds.append({
            "expert_type": "quantum_mechanics_expert",
            "validity_confidence": validity,
            "unity_confidence": unity,
            "phi_resonance_score": phi_res,
            "consciousness_score": consciousness,
            "uncertainty_estimate": uncertainty,
            "mathematical_errors": mathematical_errors,
            "improvement_suggestions": improvement_suggestions,
            "computational_cost": 0.08,
        })
    return preds


# ----------------------------------------------------------------------------
# Pure-JAX reference (same bf16 weights / bf16 activations, f32 accumulation)
# ----------------------------------------------------------------------------
def qm_expert_reference(x, params):
    f32, bf16 = jnp.float32, jnp.bfloat16

    def bdot(a, w):
        return jnp.dot(a.astype(bf16), w, preferred_element_type=f32)

    h = jnp.tanh(bdot(x, params["w1"]) + params["b1"])
    q = jnp.tanh(bdot(h, params["w2"]) + params["b2"])
    fused = bdot(q, params["w_br"]) + params["b_br"]
    wf_h = fused[:, 0:256]
    m_h = jnp.maximum(fused[:, 256:512], 0.0)
    e_h = jnp.tanh(fused[:, 512:768])
    coh = fused[:, 768:896]
    wf = jax.nn.sigmoid(bdot(wf_h, params["wwf2"]) + params["bwf2"])
    m_logits = bdot(m_h, params["wm2"]) + params["bm2"]
    meas = jax.nn.softmax(m_logits, axis=-1)
    ent = bdot(e_h, params["we2"]) + params["be2"]
    head = (bdot(wf, params["wh_wf"]) + bdot(meas, params["wh_m"])
            + bdot(ent, params["wh_e"]) + bdot(coh, params["wh_c"]) + params["bh"])
    wf_mean = jnp.mean(wf, axis=-1, keepdims=True)
    ent_mean = jnp.mean(ent, axis=-1, keepdims=True)
    return jnp.concatenate([head[:, 0:3], wf_mean, ent_mean], axis=-1)  # [B, 5]


# ----------------------------------------------------------------------------
# Deterministic parameter init (PyTorch-style uniform(+-1/sqrt(fan_in)))
# with packing: fused branch L1, per-segment padded heads, bf16 weights.
# ----------------------------------------------------------------------------
def init_params(key, embed_dim=256, hidden_dim=512):
    def linear(key, fan_in, fan_out):
        kw, kb = jax.random.split(key)
        bound = 1.0 / math.sqrt(fan_in)
        w = jax.random.uniform(kw, (fan_in, fan_out), jnp.float32, -bound, bound)
        b = jax.random.uniform(kb, (1, fan_out), jnp.float32, -bound, bound)
        return w, b

    h2 = hidden_dim // 2
    keys = jax.random.split(key, 12)
    w1, b1 = linear(keys[0], embed_dim, hidden_dim)
    w2, b2 = linear(keys[1], hidden_dim, h2)
    wwf1, bwf1 = linear(keys[2], h2, 256)
    wwf2, bwf2 = linear(keys[3], 256, 128)
    wm1, bm1 = linear(keys[4], h2, 256)
    wm2, bm2 = linear(keys[5], 256, 64)
    we1, be1 = linear(keys[6], h2, 256)
    we2, be2 = linear(keys[7], 256, 32)
    wc, bc = linear(keys[8], h2, 16)
    wv, bv = linear(keys[9], 240, 1)
    wu, bu = linear(keys[10], 240, 1)
    wq, bq = linear(keys[11], 240, 1)

    # Fused branch first layer: [wwf1 | wm1 | we1 | wc] -> [h2, 784] -> pad 896.
    w_br = jnp.concatenate([wwf1, wm1, we1, wc], axis=-1)
    w_br = jnp.pad(w_br, ((0, 0), (0, _BR_PAD - _BR_REAL)))
    b_br = jnp.concatenate([bwf1, bm1, be1, bc], axis=-1)
    b_br = jnp.pad(b_br, ((0, 0), (0, _BR_PAD - _BR_REAL)))

    # Heads: stacked (validity | unity | uncertainty) -> [240, 3], then split by
    # combined-feature segment and zero-pad each to 128 output lanes.
    wh = jnp.concatenate([wv, wu, wq], axis=-1)        # [240, 3]
    bh = jnp.concatenate([bv, bu, bq], axis=-1)        # [1, 3]
    pad_out = _OUT_W - 3
    wh_wf = jnp.pad(wh[0:128], ((0, 0), (0, pad_out)))                 # [128, 128]
    wh_m = jnp.pad(wh[128:192], ((0, 0), (0, pad_out)))                # [64, 128]
    wh_e = jnp.pad(wh[192:224], ((0, 0), (0, pad_out)))                # [32, 128]
    wh_c = jnp.pad(wh[224:240], ((0, 128 - 16), (0, pad_out)))         # [128, 128]
    bh_pad = jnp.pad(bh, ((0, 0), (0, pad_out)))                       # [1, 128]

    bf16 = jnp.bfloat16
    f32 = jnp.float32
    return {
        "w1": w1.astype(bf16), "b1": b1.astype(f32),
        "w2": w2.astype(bf16), "b2": b2.astype(f32),
        "w_br": w_br.astype(bf16), "b_br": b_br.astype(f32),
        "wwf2": wwf2.astype(bf16), "bwf2": bwf2.astype(f32),
        "wm2": wm2.astype(bf16), "bm2": bm2.astype(f32),
        "we2": we2.astype(bf16), "be2": be2.astype(f32),
        "wh_wf": wh_wf.astype(bf16), "wh_m": wh_m.astype(bf16),
        "wh_e": wh_e.astype(bf16), "wh_c": wh_c.astype(bf16),
        "bh": bh_pad.astype(f32),
    }


if __name__ == "__main__":
    embed_dim, hidden_dim, batch = 256, 512, 16
    key = jax.random.PRNGKey(0)
    k_param, k_x = jax.random.split(key)

    params = init_params(k_param, embed_dim, hidden_dim)
    x = jax.random.normal(k_x, (batch, embed_dim), dtype=jnp.float32)

    raw = qm_expert_forward_raw(x, params)
    jax.block_until_ready(raw)

    # Numerical check against the pure-JAX reference (bf16 weights both sides).
    ref = qm_expert_reference(x, params)
    np.testing.assert_allclose(np.asarray(raw[:, :5]), np.asarray(ref),
                               rtol=2e-2, atol=2e-2)

    preds = qm_expert_predict_batch(x, params)
    assert len(preds) == batch
    for p in preds:
        assert 0.0 <= p["validity_confidence"] <= 1.0
        assert 0.0 <= p["unity_confidence"] <= 1.0
        assert 0.0 <= p["phi_resonance_score"] <= 1.0
        assert 0.0 <= p["uncertainty_estimate"] <= 1.0
        assert p["consciousness_score"] >= 0.0

    print("KERNEL_OK")
</pallas_src>

<mosaic_0001>
module attributes {stable_mosaic.version = 11 : i64} {
  func.func @_qm_expert_kernel(%arg0: i32, %arg1: memref<8x256xf32, #tpu.memory_space<vmem>>, %arg2: memref<256x512xbf16, #tpu.memory_space<vmem>>, %arg3: memref<1x512xf32, #tpu.memory_space<vmem>>, %arg4: memref<512x256xbf16, #tpu.memory_space<vmem>>, %arg5: memref<1x256xf32, #tpu.memory_space<vmem>>, %arg6: memref<256x896xbf16, #tpu.memory_space<vmem>>, %arg7: memref<1x896xf32, #tpu.memory_space<vmem>>, %arg8: memref<256x128xbf16, #tpu.memory_space<vmem>>, %arg9: memref<1x128xf32, #tpu.memory_space<vmem>>, %arg10: memref<256x64xbf16, #tpu.memory_space<vmem>>, %arg11: memref<1x64xf32, #tpu.memory_space<vmem>>, %arg12: memref<256x32xbf16, #tpu.memory_space<vmem>>, %arg13: memref<1x32xf32, #tpu.memory_space<vmem>>, %arg14: memref<128x128xbf16, #tpu.memory_space<vmem>>, %arg15: memref<64x128xbf16, #tpu.memory_space<vmem>>, %arg16: memref<32x128xbf16, #tpu.memory_space<vmem>>, %arg17: memref<128x128xbf16, #tpu.memory_space<vmem>>, %arg18: memref<1x128xf32, #tpu.memory_space<vmem>>, %arg19: memref<8x128xf32, #tpu.memory_space<vmem>>) attributes {dimension_semantics = [#tpu.dimension_semantics<parallel>], iteration_bounds = array<i64: 2>, scalar_prefetch = 0 : i64, scratch_operands = 0 : i64, tpu.core_type = #tpu.core_type<tc>, window_params = [{transform_indices = @transform_0, window_bounds = array<i64: 8, 256>}, {pipeline_mode = #tpu.pipeline_mode<synchronous>, transform_indices = @transform_1, window_bounds = array<i64: 256, 512>}, {pipeline_mode = #tpu.pipeline_mode<synchronous>, transform_indices = @transform_2, window_bounds = array<i64: 1, 512>}, {pipeline_mode = #tpu.pipeline_mode<synchronous>, transform_indices = @transform_3, window_bounds = array<i64: 512, 256>}, {pipeline_mode = #tpu.pipeline_mode<synchronous>, transform_indices = @transform_4, window_bounds = array<i64: 1, 256>}, {pipeline_mode = #tpu.pipeline_mode<synchronous>, transform_indices = @transform_5, window_bounds = array<i64: 256, 896>}, {pipeline_mode = #tpu.pipeline_mode<synchronous>, transform_indices = @transform_6, window_bounds = array<i64: 1, 896>}, {pipeline_mode = #tpu.pipeline_mode<synchronous>, transform_indices = @transform_7, window_bounds = array<i64: 256, 128>}, {pipeline_mode = #tpu.pipeline_mode<synchronous>, transform_indices = @transform_8, window_bounds = array<i64: 1, 128>}, {pipeline_mode = #tpu.pipeline_mode<synchronous>, transform_indices = @transform_9, window_bounds = array<i64: 256, 64>}, {pipeline_mode = #tpu.pipeline_mode<synchronous>, transform_indices = @transform_10, window_bounds = array<i64: 1, 64>}, {pipeline_mode = #tpu.pipeline_mode<synchronous>, transform_indices = @transform_11, window_bounds = array<i64: 256, 32>}, {pipeline_mode = #tpu.pipeline_mode<synchronous>, transform_indices = @transform_12, window_bounds = array<i64: 1, 32>}, {pipeline_mode = #tpu.pipeline_mode<synchronous>, transform_indices = @transform_13, window_bounds = array<i64: 128, 128>}, {pipeline_mode = #tpu.pipeline_mode<synchronous>, transform_indices = @transform_14, window_bounds = array<i64: 64, 128>}, {pipeline_mode = #tpu.pipeline_mode<synchronous>, transform_indices = @transform_15, window_bounds = array<i64: 32, 128>}, {pipeline_mode = #tpu.pipeline_mode<synchronous>, transform_indices = @transform_16, window_bounds = array<i64: 128, 128>}, {pipeline_mode = #tpu.pipeline_mode<synchronous>, transform_indices = @transform_17, window_bounds = array<i64: 1, 128>}, {transform_indices = @transform_18, window_bounds = array<i64: 8, 128>}]} {
    %c0 = arith.constant 0 : index
    %c0_0 = arith.constant 0 : index
    %0 = vector.load %arg1[%c0, %c0_0] : memref<8x256xf32, #tpu.memory_space<vmem>>, vector<8x256xf32>
    %1 = arith.truncf %0 : vector<8x256xf32> to vector<8x256xbf16>
    %c0_1 = arith.constant 0 : index
    %c0_2 = arith.constant 0 : index
    %2 = vector.load %arg2[%c0_1, %c0_2] : memref<256x512xbf16, #tpu.memory_space<vmem>>, vector<256x512xbf16>
    %cst = arith.constant dense<0.000000e+00> : vector<8x512xf32>
    %3 = tpu.matmul %1, %2, %cst {dimension_numbers = #tpu.dot_dimension_numbers<[1], [0], [0], [1], [0, 0, 1, 1], [], []>} : vector<8x256xbf16>, vector<256x512xbf16>, vector<8x512xf32> -> vector<8x512xf32>
    %c0_3 = arith.constant 0 : index
    %c0_4 = arith.constant 0 : index
    %4 = vector.load %arg3[%c0_3, %c0_4] : memref<1x512xf32, #tpu.memory_space<vmem>>, vector<1x512xf32>
    %5 = vector.broadcast %4 : vector<1x512xf32> to vector<8x512xf32>
    %6 = arith.addf %3, %5 : vector<8x512xf32>
    %7 = math.tanh %6 : vector<8x512xf32>
    %8 = arith.truncf %7 : vector<8x512xf32> to vector<8x512xbf16>
    %c0_5 = arith.constant 0 : index
    %c0_6 = arith.constant 0 : index
    %9 = vector.load %arg4[%c0_5, %c0_6] : memref<512x256xbf16, #tpu.memory_space<vmem>>, vector<512x256xbf16>
    %cst_7 = arith.constant dense<0.000000e+00> : vector<8x256xf32>
    %10 = tpu.matmul %8, %9, %cst_7 {dimension_numbers = #tpu.dot_dimension_numbers<[1], [0], [0], [1], [0, 0, 1, 1], [], []>} : vector<8x512xbf16>, vector<512x256xbf16>, vector<8x256xf32> -> vector<8x256xf32>
    %c0_8 = arith.constant 0 : index
    %c0_9 = arith.constant 0 : index
    %11 = vector.load %arg5[%c0_8, %c0_9] : memref<1x256xf32, #tpu.memory_space<vmem>>, vector<1x256xf32>
    %12 = vector.broadcast %11 : vector<1x256xf32> to vector<8x256xf32>
    %13 = arith.addf %10, %12 : vector<8x256xf32>
    %14 = math.tanh %13 : vector<8x256xf32>
    %15 = arith.truncf %14 : vector<8x256xf32> to vector<8x256xbf16>
    %c0_10 = arith.constant 0 : index
    %c0_11 = arith.constant 0 : index
    %16 = vector.load %arg6[%c0_10, %c0_11] : memref<256x896xbf16, #tpu.memory_space<vmem>>, vector<256x896xbf16>
    %cst_12 = arith.constant dense<0.000000e+00> : vector<8x896xf32>
    %17 = tpu.matmul %15, %16, %cst_12 {dimension_numbers = #tpu.dot_dimension_numbers<[1], [0], [0], [1], [0, 0, 1, 1], [], []>} : vector<8x256xbf16>, vector<256x896xbf16>, vector<8x896xf32> -> vector<8x896xf32>
    %c0_13 = arith.constant 0 : index
    %c0_14 = arith.constant 0 : index
    %18 = vector.load %arg7[%c0_13, %c0_14] : memref<1x896xf32, #tpu.memory_space<vmem>>, vector<1x896xf32>
    %19 = vector.broadcast %18 : vector<1x896xf32> to vector<8x896xf32>
    %20 = arith.addf %17, %19 : vector<8x896xf32>
    %21 = vector.extract_strided_slice %20 {offsets = [0, 0], sizes = [8, 256], strides = [1, 1]} : vector<8x896xf32> to vector<8x256xf32>
    %22 = vector.extract_strided_slice %20 {offsets = [0, 256], sizes = [8, 256], strides = [1, 1]} : vector<8x896xf32> to vector<8x256xf32>
    %cst_15 = arith.constant 0.000000e+00 : f32
    %23 = vector.broadcast %cst_15 : f32 to vector<8x256xf32>
    %24 = arith.maximumf %22, %23 : vector<8x256xf32>
    %25 = vector.extract_strided_slice %20 {offsets = [0, 512], sizes = [8, 256], strides = [1, 1]} : vector<8x896xf32> to vector<8x256xf32>
    %26 = math.tanh %25 : vector<8x256xf32>
    %27 = vector.extract_strided_slice %20 {offsets = [0, 768], sizes = [8, 128], strides = [1, 1]} : vector<8x896xf32> to vector<8x128xf32>
    %28 = arith.truncf %21 : vector<8x256xf32> to vector<8x256xbf16>
    %c0_16 = arith.constant 0 : index
    %c0_17 = arith.constant 0 : index
    %29 = vector.load %arg8[%c0_16, %c0_17] : memref<256x128xbf16, #tpu.memory_space<vmem>>, vector<256x128xbf16>
    %cst_18 = arith.constant dense<0.000000e+00> : vector<8x128xf32>
    %30 = tpu.matmul %28, %29, %cst_18 {dimension_numbers = #tpu.dot_dimension_numbers<[1], [0], [0], [1], [0, 0, 1, 1], [], []>} : vector<8x256xbf16>, vector<256x128xbf16>, vector<8x128xf32> -> vector<8x128xf32>
    %c0_19 = arith.constant 0 : index
    %c0_20 = arith.constant 0 : index
    %31 = vector.load %arg9[%c0_19, %c0_20] : memref<1x128xf32, #tpu.memory_space<vmem>>, vector<1x128xf32>
    %32 = vector.broadcast %31 : vector<1x128xf32> to vector<8x128xf32>
    %33 = arith.addf %30, %32 : vector<8x128xf32>
    %34 = arith.negf %33 : vector<8x128xf32>
    %35 = math.exp %34 : vector<8x128xf32>
    %cst_21 = arith.constant 1.000000e+00 : f32
    %36 = vector.broadcast %cst_21 : f32 to vector<8x128xf32>
    %37 = arith.addf %36, %35 : vector<8x128xf32>
    %38 = arith.divf %36, %37 : vector<8x128xf32>
    %39 = arith.truncf %24 : vector<8x256xf32> to vector<8x256xbf16>
    %c0_22 = arith.constant 0 : index
    %c0_23 = arith.constant 0 : index
    %40 = vector.load %arg10[%c0_22, %c0_23] : memref<256x64xbf16, #tpu.memory_space<vmem>>, vector<256x64xbf16>
    %cst_24 = arith.constant dense<0.000000e+00> : vector<8x64xf32>
    %41 = tpu.matmul %39, %40, %cst_24 {dimension_numbers = #tpu.dot_dimension_numbers<[1], [0], [0], [1], [0, 0, 1, 1], [], []>} : vector<8x256xbf16>, vector<256x64xbf16>, vector<8x64xf32> -> vector<8x64xf32>
    %c0_25 = arith.constant 0 : index
    %c0_26 = arith.constant 0 : index
    %42 = vector.load %arg11[%c0_25, %c0_26] : memref<1x64xf32, #tpu.memory_space<vmem>>, vector<1x64xf32>
    %43 = vector.broadcast %42 : vector<1x64xf32> to vector<8x64xf32>
    %44 = arith.addf %41, %43 : vector<8x64xf32>
    %cst_27 = arith.constant dense<0xFF800000> : vector<8xf32>
    %45 = vector.multi_reduction <maximumf>, %44, %cst_27 [1] : vector<8x64xf32> to vector<8xf32>
    %46 = vector.shape_cast %45 : vector<8xf32> to vector<8x1xf32>
    %47 = vector.broadcast %46 : vector<8x1xf32> to vector<8x64xf32>
    %48 = arith.subf %44, %47 : vector<8x64xf32>
    %49 = math.exp %48 : vector<8x64xf32>
    %cst_28 = arith.constant dense<0.000000e+00> : vector<8xf32>
    %50 = vector.multi_reduction <add>, %49, %cst_28 [1] : vector<8x64xf32> to vector<8xf32>
    %51 = vector.shape_cast %50 : vector<8xf32> to vector<8x1xf32>
    %52 = vector.broadcast %51 : vector<8x1xf32> to vector<8x64xf32>
    %53 = arith.divf %49, %52 : vector<8x64xf32>
    %54 = arith.truncf %26 : vector<8x256xf32> to vector<8x256xbf16>
    %c0_29 = arith.constant 0 : index
    %c0_30 = arith.constant 0 : index
    %55 = vector.load %arg12[%c0_29, %c0_30] : memref<256x32xbf16, #tpu.memory_space<vmem>>, vector<256x32xbf16>
    %cst_31 = arith.constant dense<0.000000e+00> : vector<8x32xf32>
    %56 = tpu.matmul %54, %55, %cst_31 {dimension_numbers = #tpu.dot_dimension_numbers<[1], [0], [0], [1], [0, 0, 1, 1], [], []>} : vector<8x256xbf16>, vector<256x32xbf16>, vector<8x32xf32> -> vector<8x32xf32>
    %c0_32 = arith.constant 0 : index
    %c0_33 = arith.constant 0 : index
    %57 = vector.load %arg13[%c0_32, %c0_33] : memref<1x32xf32, #tpu.memory_space<vmem>>, vector<1x32xf32>
    %58 = vector.broadcast %57 : vector<1x32xf32> to vector<8x32xf32>
    %59 = arith.addf %56, %58 : vector<8x32xf32>
    %60 = arith.truncf %38 : vector<8x128xf32> to vector<8x128xbf16>
    %c0_34 = arith.constant 0 : index
    %c0_35 = arith.constant 0 : index
    %61 = vector.load %arg14[%c0_34, %c0_35] : memref<128x128xbf16, #tpu.memory_space<vmem>>, vector<128x128xbf16>
    %cst_36 = arith.constant dense<0.000000e+00> : vector<8x128xf32>
    %62 = tpu.matmul %60, %61, %cst_36 {dimension_numbers = #tpu.dot_dimension_numbers<[1], [0], [0], [1], [0, 0, 1, 1], [], []>} : vector<8x128xbf16>, vector<128x128xbf16>, vector<8x128xf32> -> vector<8x128xf32>
    %63 = arith.truncf %53 : vector<8x64xf32> to vector<8x64xbf16>
    %c0_37 = arith.constant 0 : index
    %c0_38 = arith.constant 0 : index
    %64 = vector.load %arg15[%c0_37, %c0_38] : memref<64x128xbf16, #tpu.memory_space<vmem>>, vector<64x128xbf16>
    %cst_39 = arith.constant dense<0.000000e+00> : vector<8x128xf32>
    %65 = tpu.matmul %63, %64, %cst_39 {dimension_numbers = #tpu.dot_dimension_numbers<[1], [0], [0], [1], [0, 0, 1, 1], [], []>} : vector<8x64xbf16>, vector<64x128xbf16>, vector<8x128xf32> -> vector<8x128xf32>
    %66 = arith.addf %62, %65 : vector<8x128xf32>
    %67 = arith.truncf %59 : vector<8x32xf32> to vector<8x32xbf16>
    %c0_40 = arith.constant 0 : index
    %c0_41 = arith.constant 0 : index
    %68 = vector.load %arg16[%c0_40, %c0_41] : memref<32x128xbf16, #tpu.memory_space<vmem>>, vector<32x128xbf16>
    %cst_42 = arith.constant dense<0.000000e+00> : vector<8x128xf32>
    %69 = tpu.matmul %67, %68, %cst_42 {dimension_numbers = #tpu.dot_dimension_numbers<[1], [0], [0], [1], [0, 0, 1, 1], [], []>} : vector<8x32xbf16>, vector<32x128xbf16>, vector<8x128xf32> -> vector<8x128xf32>
    %70 = arith.addf %66, %69 : vector<8x128xf32>
    %71 = arith.truncf %27 : vector<8x128xf32> to vector<8x128xbf16>
    %c0_43 = arith.constant 0 : index
    %c0_44 = arith.constant 0 : index
    %72 = vector.load %arg17[%c0_43, %c0_44] : memref<128x128xbf16, #tpu.memory_space<vmem>>, vector<128x128xbf16>
    %cst_45 = arith.constant dense<0.000000e+00> : vector<8x128xf32>
    %73 = tpu.matmul %71, %72, %cst_45 {dimension_numbers = #tpu.dot_dimension_numbers<[1], [0], [0], [1], [0, 0, 1, 1], [], []>} : vector<8x128xbf16>, vector<128x128xbf16>, vector<8x128xf32> -> vector<8x128xf32>
    %74 = arith.addf %70, %73 : vector<8x128xf32>
    %c0_46 = arith.constant 0 : index
    %c0_47 = arith.constant 0 : index
    %75 = vector.load %arg18[%c0_46, %c0_47] : memref<1x128xf32, #tpu.memory_space<vmem>>, vector<1x128xf32>
    %76 = vector.broadcast %75 : vector<1x128xf32> to vector<8x128xf32>
    %77 = arith.addf %74, %76 : vector<8x128xf32>
    %cst_48 = arith.constant dense<0.000000e+00> : vector<8xf32>
    %78 = vector.multi_reduction <add>, %38, %cst_48 [1] : vector<8x128xf32> to vector<8xf32>
    %79 = vector.shape_cast %78 : vector<8xf32> to vector<8x1xf32>
    %cst_49 = arith.constant 1.280000e+02 : f32
    %80 = vector.broadcast %cst_49 : f32 to vector<8x1xf32>
    %81 = arith.divf %79, %80 : vector<8x1xf32>
    %cst_50 = arith.constant dense<0.000000e+00> : vector<8xf32>
    %82 = vector.multi_reduction <add>, %59, %cst_50 [1] : vector<8x32xf32> to vector<8xf32>
    %83 = vector.shape_cast %82 : vector<8xf32> to vector<8x1xf32>
    %cst_51 = arith.constant 3.200000e+01 : f32
    %84 = vector.broadcast %cst_51 : f32 to vector<8x1xf32>
    %85 = arith.divf %83, %84 : vector<8x1xf32>
    %86 = tpu.iota {dimensions = array<i32: 1>} : vector<1x128xi32>
    %c3_i32 = arith.constant 3 : i32
    %87 = vector.broadcast %c3_i32 : i32 to vector<1x128xi32>
    %88 = arith.cmpi eq, %86, %87 : vector<1x128xi32>
    %cst_52 = arith.constant 0.000000e+00 : f32
    %89 = vector.shape_cast %88 : vector<1x128xi1> to vector<1x128xi1>
    %90 = vector.broadcast %89 : vector<1x128xi1> to vector<8x128xi1>
    %91 = vector.shape_cast %81 : vector<8x1xf32> to vector<8x1xf32>
    %92 = vector.broadcast %91 : vector<8x1xf32> to vector<8x128xf32>
    %93 = vector.broadcast %cst_52 : f32 to vector<8x128xf32>
    %94 = arith.select %90, %92, %93 : vector<8x128xi1>, vector<8x128xf32>
    %95 = arith.addf %77, %94 : vector<8x128xf32>
    %c4_i32 = arith.constant 4 : i32
    %96 = vector.broadcast %c4_i32 : i32 to vector<1x128xi32>
    %97 = arith.cmpi eq, %86, %96 : vector<1x128xi32>
    %cst_53 = arith.constant 0.000000e+00 : f32
    %98 = vector.shape_cast %97 : vector<1x128xi1> to vector<1x128xi1>
    %99 = vector.broadcast %98 : vector<1x128xi1> to vector<8x128xi1>
    %100 = vector.shape_cast %85 : vector<8x1xf32> to vector<8x1xf32>
    %101 = vector.broadcast %100 : vector<8x1xf32> to vector<8x128xf32>
    %102 = vector.broadcast %cst_53 : f32 to vector<8x128xf32>
    %103 = arith.select %99, %101, %102 : vector<8x128xi1>, vector<8x128xf32>
    %104 = arith.addf %95, %103 : vector<8x128xf32>
    %c0_54 = arith.constant 0 : index
    %c0_55 = arith.constant 0 : index
    %105 = vector.load %arg19[%c0_54, %c0_55] : memref<8x128xf32, #tpu.memory_space<vmem>>, vector<8x128xf32>
    tpu.vector_store %arg19[%c0_54, %c0_55], %104 {strides = array<i32>} : memref<8x128xf32, #tpu.memory_space<vmem>>, vector<8x128xf32>,
    return
  }
  func.func @transform_0(%arg0: i32) -> (i32, i32) {
    %c0_i32 = arith.constant 0 : i32
    %c0_i32_0 = arith.constant 0 : i32
    return %arg0, %c0_i32 : i32, i32
  }
  func.func @transform_1(%arg0: i32) -> (i32, i32) {
    %c0_i32 = arith.constant 0 : i32
    %c0_i32_0 = arith.constant 0 : i32
    %c0_i32_1 = arith.constant 0 : i32
    return %c0_i32, %c0_i32_0 : i32, i32
  }
  func.func @transform_2(%arg0: i32) -> (i32, i32) {
    %c0_i32 = arith.constant 0 : i32
    %c0_i32_0 = arith.constant 0 : i32
    %c0_i32_1 = arith.constant 0 : i32
    return %c0_i32, %c0_i32_0 : i32, i32
  }
  func.func @transform_3(%arg0: i32) -> (i32, i32) {
    %c0_i32 = arith.constant 0 : i32
    %c0_i32_0 = arith.constant 0 : i32
    %c0_i32_1 = arith.constant 0 : i32
    return %c0_i32, %c0_i32_0 : i32, i32
  }
  func.func @transform_4(%arg0: i32) -> (i32, i32) {
    %c0_i32 = arith.constant 0 : i32
    %c0_i32_0 = arith.constant 0 : i32
    %c0_i32_1 = arith.constant 0 : i32
    return %c0_i32, %c0_i32_0 : i32, i32
  }
  func.func @transform_5(%arg0: i32) -> (i32, i32) {
    %c0_i32 = arith.constant 0 : i32
    %c0_i32_0 = arith.constant 0 : i32
    %c0_i32_1 = arith.constant 0 : i32
    return %c0_i32, %c0_i32_0 : i32, i32
  }
  func.func @transform_6(%arg0: i32) -> (i32, i32) {
    %c0_i32 = arith.constant 0 : i32
    %c0_i32_0 = arith.constant 0 : i32
    %c0_i32_1 = arith.constant 0 : i32
    return %c0_i32, %c0_i32_0 : i32, i32
  }
  func.func @transform_7(%arg0: i32) -> (i32, i32) {
    %c0_i32 = arith.constant 0 : i32
    %c0_i32_0 = arith.constant 0 : i32
    %c0_i32_1 = arith.constant 0 : i32
    return %c0_i32, %c0_i32_0 : i32, i32
  }
  func.func @transform_8(%arg0: i32) -> (i32, i32) {
    %c0_i32 = arith.constant 0 : i32
    %c0_i32_0 = arith.constant 0 : i32
    %c0_i32_1 = arith.constant 0 : i32
    return %c0_i32, %c0_i32_0 : i32, i32
  }
  func.func @transform_9(%arg0: i32) -> (i32, i32) {
    %c0_i32 = arith.constant 0 : i32
    %c0_i32_0 = arith.constant 0 : i32
    %c0_i32_1 = arith.constant 0 : i32
    return %c0_i32, %c0_i32_0 : i32, i32
  }
  func.func @transform_10(%arg0: i32) -> (i32, i32) {
    %c0_i32 = arith.constant 0 : i32
    %c0_i32_0 = arith.constant 0 : i32
    %c0_i32_1 = arith.constant 0 : i32
    return %c0_i32, %c0_i32_0 : i32, i32
  }
  func.func @transform_11(%arg0: i32) -> (i32, i32) {
    %c0_i32 = arith.constant 0 : i32
    %c0_i32_0 = arith.constant 0 : i32
    %c0_i32_1 = arith.constant 0 : i32
    return %c0_i32, %c0_i32_0 : i32, i32
  }
  func.func @transform_12(%arg0: i32) -> (i32, i32) {
    %c0_i32 = arith.constant 0 : i32
    %c0_i32_0 = arith.constant 0 : i32
    %c0_i32_1 = arith.constant 0 : i32
    return %c0_i32, %c0_i32_0 : i32, i32
  }
  func.func @transform_13(%arg0: i32) -> (i32, i32) {
    %c0_i32 = arith.constant 0 : i32
    %c0_i32_0 = arith.constant 0 : i32
    %c0_i32_1 = arith.constant 0 : i32
    return %c0_i32, %c0_i32_0 : i32, i32
  }
  func.func @transform_14(%arg0: i32) -> (i32, i32) {
    %c0_i32 = arith.constant 0 : i32
    %c0_i32_0 = arith.constant 0 : i32
    %c0_i32_1 = arith.constant 0 : i32
    return %c0_i32, %c0_i32_0 : i32, i32
  }
  func.func @transform_15(%arg0: i32) -> (i32, i32) {
    %c0_i32 = arith.constant 0 : i32
    %c0_i32_0 = arith.constant 0 : i32
    %c0_i32_1 = arith.constant 0 : i32
    return %c0_i32, %c0_i32_0 : i32, i32
  }
  func.func @transform_16(%arg0: i32) -> (i32, i32) {
    %c0_i32 = arith.constant 0 : i32
    %c0_i32_0 = arith.constant 0 : i32
    %c0_i32_1 = arith.constant 0 : i32
    return %c0_i32, %c0_i32_0 : i32, i32
  }
  func.func @transform_17(%arg0: i32) -> (i32, i32) {
    %c0_i32 = arith.constant 0 : i32
    %c0_i32_0 = arith.constant 0 : i32
    %c0_i32_1 = arith.constant 0 : i32
    return %c0_i32, %c0_i32_0 : i32, i32
  }
  func.func @transform_18(%arg0: i32) -> (i32, i32) {
    %c0_i32 = arith.constant 0 : i32
    %c0_i32_0 = arith.constant 0 : i32
    return %arg0, %c0_i32 : i32, i32
  }
}

</mosaic_0001>

<bundles_post_ra>
// kernel: qm_expert_forward_raw.1
= control target key start
LH: loop header
LB: loop body
LE: loop exit
PB: predicated region body
PF: predicated region fallthrough
CT: control target
= control target key end

     0   :  { %s6264_s0 = inlined_call_operand.vmem [shape: f32[16,256], index: 0, kind: input, shape index: {}]   ;;  %s6265_s1 = inlined_call_operand.hbm [shape: bf16[256,512], index: 1, kind: input, shape index: {}]   ;;  %s6266_s2 = inlined_call_operand.hbm [shape: f32[1,512], index: 2, kind: input, shape index: {}]   ;;  %s6267_s3 = inlined_call_operand.hbm [shape: bf16[512,256], index: 3, kind: input, shape index: {}]   ;;  %s6268_s4 = inlined_call_operand.hbm [shape: f32[1,256], index: 4, kind: input, shape index: {}]   ;;  %s6269_s5 = inlined_call_operand.hbm [shape: bf16[256,896], index: 5, kind: input, shape index: {}]   ;;  %s6270_s6 = inlined_call_operand.hbm [shape: f32[1,896], index: 6, kind: input, shape index: {}]   ;;  %s6271_s7 = inlined_call_operand.vmem [shape: bf16[256,128], index: 7, kind: input, shape index: {}]   ;;  %s6272_s8 = inlined_call_operand.vmem [shape: f32[1,128], index: 8, kind: input, shape index: {}]   ;;  %s6273_s9 = inlined_call_operand.vmem [shape: bf16[256,64], index: 9, kind: input, shape index: {}]   ;;  %s6274_s10 = inlined_call_operand.vmem [shape: f32[1,64], index: 10, kind: input, shape index: {}]   ;;  %s6275_s11 = inlined_call_operand.vmem [shape: bf16[256,32], index: 11, kind: input, shape index: {}]   ;;  %s6276_s12 = inlined_call_operand.vmem [shape: f32[1,32], index: 12, kind: input, shape index: {}]   ;;  %s6277_s13 = inlined_call_operand.vmem [shape: bf16[128,128], index: 13, kind: input, shape index: {}]   ;;  %s6278_s14 = inlined_call_operand.hbm [shape: bf16[64,128], index: 14, kind: input, shape index: {}]   ;;  %s6279_s15 = inlined_call_operand.hbm [shape: bf16[32,128], index: 15, kind: input, shape index: {}]   ;;  %s6280_s16 = inlined_call_operand.vmem [shape: bf16[128,128], index: 16, kind: input, shape index: {}]   ;;  %s6281_s17 = inlined_call_operand.hbm [shape: f32[1,128], index: 17, kind: input, shape index: {}]   ;;  %s6282_s18 = inlined_call_operand.hbm [shape: f32[16,128], index: 18, kind: output, shape index: {}]  }
   0x1   :  { %6295 = sst [smem:[#allocation32_spill]] %s6264_s0 }
   0x2   :  { %6296 = sst [smem:[#allocation33_spill]] %s6265_s1 }
   0x3   :  { %6297 = sst [smem:[#allocation34_spill]] %s6266_s2 }
   0x4   :  { %6298 = sst [smem:[#allocation35_spill]] %s6268_s4 }
   0x5   :  { %6299 = sst [smem:[#allocation36_spill]] %s6270_s6 }
   0x6   :  { %6300 = sst [smem:[#allocation37_spill]] %s6279_s15 }
   0x7   :  { %6301 = sst [smem:[#allocation38_spill]] %s6282_s18 }
   0x8   :  { %23 = vsyncpa [#allocation3], 0 }
   0x9   :  { %24 = vsyncpa [#allocation6], 0 }
   0xa   :  { %25 = vsyncpa [#allocation9], 0 }
   0xb   :  { %26 = vsyncpa [#allocation12], 0 }
   0xc   :  { %27 = vsyncpa [#allocation15], 0 }
   0xd   :  { %28 = vsyncpa [#allocation4], 0 }
   0xe   :  { %30 = vsyncpa [#allocation4 + $0x1], 0  ;;  %s5820_s27 = smov 0   ;;  %s5822_s28 = smov 0  }
   0xf   :  { %s5824_s29 = smov 0   ;;  %s5826_s30 = smov 0  }
  0x10 LB: > { %6302 = sst [smem:[#allocation24_spill]] %s5692_s27  ;;  %s5841_s0 = sadd.s32 4294967295, %s5704_s30   ;;  %s5704_s30 = sphi %s5826_s30, %s6327_s30   ;;  %s5700_s29 = sphi %s5824_s29, %s6330_s29   ;;  %s5696_s28 = sphi %s5822_s28, %s6329_s28   ;;  %s5692_s27 = sphi %s5820_s27, %s6328_s27  }
  0x11   : > { %6303 = sst [smem:[#allocation25_spill]] %s5696_s28  ;;  %s3597_s19 = sadd.s32 4294967294, %s5704_s30  }
  0x12   : > { %6304 = sst [smem:[#allocation26_spill]] %s5700_s29  ;;  %s5845_s1 = sadd.s32 1, %s5704_s30  }
  0x13   : > { %6305 = sst [smem:[#allocation27_spill]] %s5704_s30  ;;  %s426_s20 = sadd.s32 1, %s5700_s29 }
  0x14   : > { %6306 = sst [smem:[#allocation28_spill]] %s5845_s1  ;;  %s423_s21 = ssub.s32 %s5704_s30, %s5845_s1 }
  0x15   : > { %p436_p0 = scmp.ne.s32.totalorder %s5700_s29, %s5696_s28  ;;  %p424_p1 = scmp.eq.s32.totalorder %s423_s21, 0 }
  0x16   : > { %p437_p2 = scmp.eq.s32.totalorder %s5841_s0, 1  ;;  %p442_p3 = scmp.ne.s32.totalorder %s5696_s28, %s5692_s27 }
  0x17   : > { %p443_p4 = scmp.eq.s32.totalorder %s3597_s19, 1  ;;  %p3598_p7 = scmp.ge.s32.totalorder %s5704_s30, 1 }
  0x18   : > { %s5856_s22 = scalar_select %p424_p1, %s5700_s29, %s426_s20  }
  0x19   : > { %p5858_p5 = por %p437_p2, %p436_p0  ;;  %p5862_p6 = por %p443_p4, %p442_p3 }
  0x1a   : > { %6307 = sst [smem:[#allocation29_spill]] %s5856_s22  ;;  %p450_p8 = scmp.lt.s32.totalorder %s5704_s30, 3 }
  0x1b   : > { %s6308_s2 = scalar_select %p5858_p5, 1, 0 }
  0x1c   : > { %s6310_s23 = scalar_select %p5862_p6, 1, 0 }
  0x1d   : > { %6309 = sst [smem:[#allocation30_spill]] %s6308_s2  ;;  %p5250_p9 = scmp.eq.s32.totalorder %s5841_s0, 0 }
  0x1e   : > { %6311 = sst [smem:[#allocation31_spill]] %s6310_s23  ;;  %p5869_p10 = pnand %p3598_p7, %p450_p8 }
  0x1f   : > { %s6313_s19 = sld [smem:[#allocation34_spill]]  ;;  %s5706_s21 = smov [#allocation5]  }
  0x20   : > { %p5218_p11 = pneg %p5869_p10  ;;  %s478_s22 = sshll.u32 %s5706_s21, 4  ;;  %s479_s22 = int_to_ptr.vmem [resolvable:$true] %s478_s22 }
  0x21   : > { %s6314_s4 = sld [smem:[#allocation35_spill]]  ;;  %s5707_s30 = smov [#allocation8]  }
  0x22   : > { %p5883_p12 = pnand %p5250_p9, %p5218_p11  ;;  %s6316_s6 = sld [smem:[#allocation36_spill]] }
  0x23   : > { %s504_s21 = sshll.u32 %s5707_s30, 4  ;;  %s5708_s29 = smov [#allocation11]   ;;  %s505_s21 = int_to_ptr.vmem [resolvable:$true] %s504_s21 }
  0x24   : > { %s530_s1 = sshll.u32 %s5708_s29, 4  ;;  %s6317_s15 = sld [smem:[#allocation37_spill]]  ;;  %s531_s1 = int_to_ptr.vmem [resolvable:$true] %s530_s1 }
  0x25   : > { %s476_s20 = sshll.u32 %s6313_s19, 4  ;;  %s5709_s25 = smov [#allocation14]   ;;  %s477_s20 = int_to_ptr.hbm [resolvable:$true] %s476_s20 }
  0x26   : > { %5224 = dma.hbm_to_vmem [thread:$0]  (!%p5883_p12), %s477_s20, 64, %s479_s22, [#allocation6]  }
  0x27   : > { %s502_s23 = sshll.u32 %s6314_s4, 4  ;;  %s576_s30 = sshll.u32 %s5709_s25, 4  ;;  %s503_s23 = int_to_ptr.hbm [resolvable:$true] %s502_s23  ;;  %s577_s30 = int_to_ptr.vmem [resolvable:$true] %s576_s30 }
  0x28   : > { %s528_s19 = sshll.u32 %s6316_s6, 4  ;;  %s6318_s20 = sld [smem:[#allocation33_spill]]  ;;  %s529_s19 = int_to_ptr.hbm [resolvable:$true] %s528_s19 }
  0x29   : > { %5230 = dma.hbm_to_vmem [thread:$0]  (!%p5883_p12), %s503_s23, 32, %s505_s21, [#allocation9]  }
  0x2a   : > { %s574_s18 = sshll.u32 %s6317_s15, 4  ;;  %s6294_s23 = smov 64   ;;  %s575_s18 = int_to_ptr.hbm [resolvable:$true] %s574_s18 }
  0x2b   : > { %5236 = dma.hbm_to_vmem [thread:$0]  (!%p5883_p12), %s529_s19, 112, %s531_s1, [#allocation12]  }
  0x2c   : > { %s5711_s21 = smov 4   ;;  %s5712_s4 = smov [#allocation2]  }
  0x2d   : > { %5242 = dma.hbm_to_vmem [thread:$0]  (!%p5883_p12), %s575_s18, 256, %s577_s30, [#allocation15], %s6294_s23, %s6294_s23, %s5711_s21  }
  0x2e   : > { %s461_s6 = sshll.u32 %s6318_s20, 4  ;;  %s463_s2 = sshll.u32 %s5712_s4, 4  ;;  %s462_s6 = int_to_ptr.hbm [resolvable:$true] %s461_s6  ;;  %s464_s2 = int_to_ptr.vmem [resolvable:$true] %s463_s2 }
  0x2f   : > { %s487_s1 = sshll.u32 %s6267_s3, 4  ;;  %s5713_s25 = smov 256   ;;  %s488_s1 = int_to_ptr.hbm [resolvable:$true] %s487_s1 }
  0x30   : > { %s5714_s26 = smov 16   ;;  %s5715_s22 = smov [#allocation7]  }
  0x31   : > { %5221 = dma.hbm_to_vmem [thread:$0]  (!%p5883_p12), %s462_s6, 8192, %s464_s2, [#allocation3], %s5713_s25, %s5713_s25, %s5714_s26  }
  0x32   : > { %s489_s20 = sshll.u32 %s5715_s22, 4  ;;  %s5716_s15 = smov 128   ;;  %s490_s20 = int_to_ptr.vmem [resolvable:$true] %s489_s20 }
  0x33   : > { %s5717_s28 = smov 8   ;;  %s513_s4 = sshll.u32 %s6269_s5, 4  ;;  %s514_s4 = int_to_ptr.hbm [resolvable:$true] %s513_s4 }
  0x34   : > { %5227 = dma.hbm_to_vmem [thread:$0]  (!%p5883_p12), %s488_s1, 8192, %s490_s20, [#allocation6], %s5716_s15, %s5716_s15, %s5717_s28  }
  0x35   : > { %s5718_s19 = smov [#allocation10]   ;;  %s560_s25 = sshll.u32 %s6278_s14, 4  ;;  %s561_s25 = int_to_ptr.hbm [resolvable:$true] %s560_s25 }
  0x36   : > { %s515_s29 = sshll.u32 %s5718_s19, 4  ;;  %s5719_s26 = smov 448   ;;  %s516_s29 = int_to_ptr.vmem [resolvable:$true] %s515_s29 }
  0x37   : > { %s5720_s22 = smov 28   ;;  %s5721_s23 = smov [#allocation13]  }
  0x38   : > { %5233 = dma.hbm_to_vmem [thread:$0]  (!%p5883_p12), %s514_s4, 14336, %s516_s29, [#allocation9], %s5719_s26, %s5719_s26, %s5720_s22  }
  0x39   : > { %s562_s15 = sshll.u32 %s5721_s23, 4  ;;  %s592_s20 = sshll.u32 %s6281_s17, 4  ;;  %s563_s15 = int_to_ptr.vmem [resolvable:$true] %s562_s15  ;;  %s593_s20 = int_to_ptr.hbm [resolvable:$true] %s592_s20 }
  0x3a   : > { %s6319_s18 = smov 64   ;;  %s5722_s30 = smov [#allocation16]  }
  0x3b   : > { %5239 = dma.hbm_to_vmem [thread:$0]  (!%p5883_p12), %s561_s25, 512, %s563_s15, [#allocation12], %s6319_s18, %s6319_s18, %s5711_s21  }
  0x3c   : > { %s594_s19 = sshll.u32 %s5722_s30, 4  ;;  %615 = sbr.rel (%p5869_p10) target bundleno = 1135 (0x46f), region = 92  ;;  %s595_s19 = int_to_ptr.vmem [resolvable:$true] %s594_s19 }
  0x3d   : > { %5245 = dma.hbm_to_vmem [thread:$0]  (!%p5883_p12), %s593_s20, 16, %s595_s19, [#allocation15]  }
  0x41   : > { %5667 = dma.done.wait (%p5250_p9), [#allocation3], 8192  }
  0x42   : > { %5669 = vsyncadd (%p5250_p9), [#allocation3], 4294959104 }
  0x43   : > { %5671 = dma.done.wait (%p5250_p9), [#allocation6], 8256  }
  0x44   : > { %5673 = vsyncadd (%p5250_p9), [#allocation6], 4294959040 }
  0x45   : > { %5675 = dma.done.wait (%p5250_p9), [#allocation9], 14368  }
  0x46   : > { %5677 = vsyncadd (%p5250_p9), [#allocation9], 4294952928 }
  0x47   : > { %5679 = dma.done.wait (%p5250_p9), [#allocation12], 624  }
  0x48   : > { %5681 = vsyncadd (%p5250_p9), [#allocation12], 4294966672 }
  0x49   : > { %5683 = dma.done.wait (%p5250_p9), [#allocation15], 272  }
  0x4a   : > { %5685 = vsyncadd (%p5250_p9), [#allocation15], 4294967024  ;;  %v3736_v0 = vld [vmem:[#allocation2 + $0xe0] sm:$0xf]  ;;  %v4900_v1 = vld [vmem:[#allocation2 + $0xec] sm:$0xf0] }
  0x4b   : > { %v3864_v2 = vld [vmem:[#allocation2 + $0x1e0] sm:$0xf]  ;;  %v3737_v3 = vor.u32 %v4900_v1, %v3736_v0  ;;  %v4932_v4 = vld [vmem:[#allocation2 + $0x1ec] sm:$0xf0]  ;;  %v4898_v5 = vld [vmem:[#allocation2 + $0xe4] sm:$0xf] }
  0x4c   : > { %v3738_v6 = vld [vmem:[#allocation2 + $0xf0] sm:$0xf0]  ;;  %v3865_v7 = vor.u32 %v4932_v4, %v3864_v2  ;;  %v4930_v9 = vld [vmem:[#allocation2 + $0x1e4] sm:$0xf]  ;;  %v3720_v11 = vld [vmem:[#allocation2 + $0xc0] sm:$0xf] }
  0x4d   : > { %v3741_v8 = vor.u32 %v4898_v5, %v3738_v6  ;;  %v3866_v10 = vld [vmem:[#allocation2 + $0x1f0] sm:$0xf0]  ;;  %1114 = vmatpush.bf16.msra.mxu0 %v3737_v3  ;;  %v4896_v13 = vld [vmem:[#allocation2 + $0xcc] sm:$0xf0]  ;;  %v3848_v14 = vld [vmem:[#allocation2 + $0x1c0] sm:$0xf] }
  0x4e   : > { %v3869_v12 = vor.u32 %v4930_v9, %v3866_v10  ;;  %v4928_v15 = vld [vmem:[#allocation2 + $0x1cc] sm:$0xf0]  ;;  %1127 = vmatpush.bf16.msra.mxu1 %v3865_v7  ;;  %v3721_v16 = vor.u32 %v4896_v13, %v3720_v11  ;;  %v4894_v18 = vld [vmem:[#allocation2 + $0xc4] sm:$0xf]  ;;  %v3722_v19 = vld [vmem:[#allocation2 + $0xd0] sm:$0xf0] }
  0x4f   : > { %1140 = vmatpush.bf16.msra.mxu2 %v3741_v8  ;;  %v3849_v17 = vor.u32 %v4928_v15, %v3848_v14  ;;  %v4926_v20 = vld [vmem:[#allocation2 + $0x1c4] sm:$0xf]  ;;  %v3725_v21 = vor.u32 %v4894_v18, %v3722_v19  ;;  %v3850_v22 = vld [vmem:[#allocation2 + $0x1d0] sm:$0xf0]  ;;  %v3704_v23 = vld [vmem:[#allocation2 + $0xa0] sm:$0xf] }
  0x50   : > { %1153 = vmatpush.bf16.msra.mxu3 %v3869_v12  ;;  %v4892_v24 = vld [vmem:[#allocation2 + $0xac] sm:$0xf0]  ;;  %v3853_v25 = vor.u32 %v4926_v20, %v3850_v22  ;;  %v3832_v26 = vld [vmem:[#allocation2 + $0x1a0] sm:$0xf]  ;;  %v4890_v28 = vld [vmem:[#allocation2 + $0xa4] sm:$0xf] }
  0x51   : > { %v4924_v27 = vld [vmem:[#allocation2 + $0x1ac] sm:$0xf0]  ;;  %1115 = vmatpush.bf16.msra.mxu0 %v3721_v16  ;;  %v3705_v29 = vor.u32 %v4892_v24, %v3704_v23  ;;  %v3706_v30 = vld [vmem:[#allocation2 + $0xb0] sm:$0xf0]  ;;  %v4922_v31 = vld [vmem:[#allocation2 + $0x1a4] sm:$0xf] }
  0x52   : > { %v3834_v32 = vld [vmem:[#allocation2 + $0x1b0] sm:$0xf0]  ;;  %1128 = vmatpush.bf16.msra.mxu1 %v3849_v17  ;;  %v3833_v33 = vor.u32 %v4924_v27, %v3832_v26  ;;  %v3709_v34 = vor.u32 %v4890_v28, %v3706_v30  ;;  %v3688_v35 = vld [vmem:[#allocation2 + $0x80] sm:$0xf]  ;;  %v4888_v36 = vld [vmem:[#allocation2 + $0x8c] sm:$0xf0] }
  0x53   : > { %1141 = vmatpush.bf16.msra.mxu2 %v3725_v21  ;;  %v3816_v37 = vld [vmem:[#allocation2 + $0x180] sm:$0xf]  ;;  %v3837_v38 = vor.u32 %v4922_v31, %v3834_v32  ;;  %v4920_v39 = vld [vmem:[#allocation2 + $0x18c] sm:$0xf0]  ;;  %v4886_v40 = vld [vmem:[#allocation2 + $0x84] sm:$0xf]  ;;  %v3689_v44 = vor.u32 %v4888_v36, %v3688_v35 }
  0x54   : > { %1154 = vmatpush.bf16.msra.mxu3 %v3853_v25  ;;  %v3690_v41 = vld [vmem:[#allocation2 + $0x90] sm:$0xf0]  ;;  %v4918_v42 = vld [vmem:[#allocation2 + $0x184] sm:$0xf]  ;;  %v3817_v45 = vor.u32 %v4920_v39, %v3816_v37  ;;  %v3672_v47 = vld [vmem:[#allocation2 + $0x60] sm:$0xf] }
  0x55   : > { %v3818_v43 = vld [vmem:[#allocation2 + $0x190] sm:$0xf0]  ;;  %1116 = vmatpush.bf16.msra.mxu0 %v3705_v29  ;;  %v3693_v46 = vor.u32 %v4886_v40, %v3690_v41  ;;  %v4884_v48 = vld [vmem:[#allocation2 + $0x6c] sm:$0xf0]  ;;  %v3800_v49 = vld [vmem:[#allocation2 + $0x160] sm:$0xf] }
  0x56   : > { %1129 = vmatpush.bf16.msra.mxu1 %v3833_v33  ;;  %v3821_v50 = vor.u32 %v4918_v42, %v3818_v43  ;;  %v4916_v51 = vld [vmem:[#allocation2 + $0x16c] sm:$0xf0]  ;;  %v4882_v52 = vld [vmem:[#allocation2 + $0x64] sm:$0xf]  ;;  %v3674_v53 = vld [vmem:[#allocation2 + $0x70] sm:$0xf0]  ;;  %v3673_v56 = vor.u32 %v4884_v48, %v3672_v47 }
  0x57   : > { %1142 = vmatpush.bf16.msra.mxu2 %v3709_v34  ;;  %v4914_v54 = vld [vmem:[#allocation2 + $0x164] sm:$0xf]  ;;  %v3802_v55 = vld [vmem:[#allocation2 + $0x170] sm:$0xf0]  ;;  %p710_p13 = scmp.lt.s32.totalorder %s5841_s0, 1  ;;  %v3801_v57 = vor.u32 %v4916_v51, %v3800_v49  ;;  %v3677_v58 = vor.u32 %v4882_v52, %v3674_v53  ;;  %s6320_s4 = sld [smem:[#allocation32_spill]] }
  0x58   : > { %1155 = vmatpush.bf16.msra.mxu3 %v3837_v38  ;;  %v3656_v59 = vld [vmem:[#allocation2 + $0x40] sm:$0xf]  ;;  %v4880_v60 = vld [vmem:[#allocation2 + $0x4c] sm:$0xf0]  ;;  %v3805_v62 = vor.u32 %v4914_v54, %v3802_v55  ;;  %v4878_v0 = vld [vmem:[#allocation2 + $0x44] sm:$0xf] }
  0x59   : > { %1117 = vmatpush.bf16.msra.mxu0 %v3689_v44  ;;  %v3784_v61 = vld [vmem:[#allocation2 + $0x140] sm:$0xf]  ;;  %v4912_v63 = vld [vmem:[#allocation2 + $0x14c] sm:$0xf0]  ;;  %v3658_v1 = vld [vmem:[#allocation2 + $0x50] sm:$0xf0]  ;;  %v3657_v4 = vor.u32 %v4880_v60, %v3656_v59 }
  0x5a   : > { %1130 = vmatpush.bf16.msra.mxu1 %v3817_v45  ;;  %v4910_v2 = vld [vmem:[#allocation2 + $0x144] sm:$0xf]  ;;  %v3786_v3 = vld [vmem:[#allocation2 + $0x150] sm:$0xf0]  ;;  %s5958_s27 = scalar_select %p710_p13, %s5841_s0, 1  ;;  %v3785_v5 = vor.u32 %v4912_v63, %v3784_v61  ;;  %v3661_v6 = vor.u32 %v4878_v0, %v3658_v1  ;;  %vm2969_vm0 = vcmask 523264  }
  0x5b   : > { %1143 = vmatpush.bf16.msra.mxu2 %v3693_v46  ;;  %v3640_v7 = vld [vmem:[#allocation2 + $0x20] sm:$0xf]  ;;  %v4876_v8 = vld [vmem:[#allocation2 + $0x2c] sm:$0xf0]  ;;  %v3789_v10 = vor.u32 %v4910_v2, %v3786_v3  ;;  %v4874_v12 = vld [vmem:[#allocation2 + $0x24] sm:$0xf] }
  0x5c   : > { %1156 = vmatpush.bf16.msra.mxu3 %v3821_v50  ;;  %v3768_v9 = vld [vmem:[#allocation2 + $0x120] sm:$0xf]  ;;  %v4908_v11 = vld [vmem:[#allocation2 + $0x12c] sm:$0xf0]  ;;  %v3642_v13 = vld [vmem:[#allocation2 + $0x30] sm:$0xf0]  ;;  %v3641_v16 = vor.u32 %v4876_v8, %v3640_v7 }
  0x5d   : > { %1118 = vmatpush.bf16.msra.mxu0 %v3673_v56  ;;  %v4906_v14 = vld [vmem:[#allocation2 + $0x124] sm:$0xf]  ;;  %v3770_v15 = vld [vmem:[#allocation2 + $0x130] sm:$0xf0]  ;;  %s4869_s24 = sshll.u32 %s5958_s27, 4  ;;  %v3769_v19 = vor.u32 %v4908_v11, %v3768_v9  ;;  %v3645_v20 = vor.u32 %v4874_v12, %v3642_v13  ;;  %vm3298_vm5 = vcmask 261120  }
  0x5e   : > { %1131 = vmatpush.bf16.msra.mxu1 %v3801_v57  ;;  %v3624_v17 = vld [vmem:[#allocation2] sm:$0xf]  ;;  %v4872_v18 = vld [vmem:[#allocation2 + $0xc] sm:$0xf0]  ;;  %v4870_v23 = vld [vmem:[#allocation2 + $0x4] sm:$0xf]  ;;  %v3773_v24 = vor.u32 %v4906_v14, %v3770_v15  ;;  %s714_s29 = scalar_lea.vmem %s6320_s4, %s4869_s24 }
  0x5f   : > { %1144 = vmatpush.bf16.msra.mxu2 %v3677_v58  ;;  %v3752_v21 = vld [vmem:[#allocation2 + $0x100] sm:$0xf]  ;;  %v4904_v22 = vld [vmem:[#allocation2 + $0x10c] sm:$0xf0]  ;;  %v3626_v25 = vld [vmem:[#allocation2 + $0x10] sm:$0xf0]  ;;  %v3625_v31 = vor.u32 %v4872_v18, %v3624_v17 }
  0x60   : > { %1157 = vmatpush.bf16.msra.mxu3 %v3805_v62  ;;  %v4902_v26 = vld [vmem:[#allocation2 + $0x104] sm:$0xf]  ;;  %v3754_v27 = vld [vmem:[#allocation2 + $0x110] sm:$0xf0]  ;;  %v3744_v28 = vld [vmem:[#allocation2 + $0xe8] sm:$0xf]  ;;  %v3753_v35 = vor.u32 %v4904_v22, %v3752_v21  ;;  %v3629_v36 = vor.u32 %v4870_v23, %v3626_v25 }
  0x61   : > { %1119 = vmatpush.bf16.msra.mxu0 %v3657_v4  ;;  %v4901_v29 = vld [vmem:[#allocation2 + $0xf4] sm:$0xf0]  ;;  %v3872_v30 = vld [vmem:[#allocation2 + $0x1e8] sm:$0xf]  ;;  %v4899_v33 = vld [vmem:[#allocation2 + $0xec] sm:$0xf]  ;;  %v3757_v40 = vor.u32 %v4902_v26, %v3754_v27 }
  0x62   : > { %1132 = vmatpush.bf16.msra.mxu1 %v3785_v5  ;;  %v4933_v32 = vld [vmem:[#allocation2 + $0x1f4] sm:$0xf0]  ;;  %v3746_v34 = vld [vmem:[#allocation2 + $0xf8] sm:$0xf0]  ;;  %v4931_v37 = vld [vmem:[#allocation2 + $0x1ec] sm:$0xf]  ;;  %v3745_v41 = vor.u32 %v4901_v29, %v3744_v28 }
  0x63   : > { %1145 = vmatpush.bf16.msra.mxu2 %v3661_v6  ;;  %v3874_v38 = vld [vmem:[#allocation2 + $0x1f8] sm:$0xf0]  ;;  %v716_v39 = vld [vmem:[%s714_s29] sm:$0xff]  ;;  %v717_v42 = vld [vmem:[%s714_s29 + $0x8] sm:$0xff]  ;;  %v3873_v43 = vor.u32 %v4933_v32, %v3872_v30  ;;  %v3749_v44 = vor.u32 %v4899_v33, %v3746_v34  ;;  %s6321_s20 = sld [smem:[#allocation25_spill]]  ;;  %s4866_s19 = sshll.u32 %s5841_s0, 3 }
  0x64   : > { %1158 = vmatpush.bf16.msra.mxu3 %v3789_v10  ;;  %v3728_v45 = vld [vmem:[#allocation2 + $0xc8] sm:$0xf]  ;;  %v4897_v46 = vld [vmem:[#allocation2 + $0xd4] sm:$0xf0]  ;;  %v3877_v48 = vor.u32 %v4931_v37, %v3874_v38  ;;  %v5964_v49 = vpack.c.bf16 %v716_v39, %v716_v39  ;;  %v4895_v51 = vld [vmem:[#allocation2 + $0xcc] sm:$0xf]  ;;  %v5966_v53 = vpack.c.bf16 %v717_v42, %v717_v42 }
  0x65   : > { %1120 = vmatpush.bf16.msra.mxu0 %v3641_v16  ;;  %v3856_v47 = vld [vmem:[#allocation2 + $0x1c8] sm:$0xf]  ;;  %v4929_v50 = vld [vmem:[#allocation2 + $0x1d4] sm:$0xf0]  ;;  %v3730_v52 = vld [vmem:[#allocation2 + $0xd8] sm:$0xf0]  ;;  %v3729_v56 = vor.u32 %v4897_v46, %v3728_v45 }
  0x66   : > { %1133 = vmatpush.bf16.msra.mxu1 %v3769_v19  ;;  %v4927_v54 = vld [vmem:[#allocation2 + $0x1cc] sm:$0xf]  ;;  %v3858_v55 = vld [vmem:[#allocation2 + $0x1d8] sm:$0xf0]  ;;  %v3857_v57 = vor.u32 %v4929_v50, %v3856_v47  ;;  %v3733_v58 = vor.u32 %v4895_v51, %v3730_v52  ;;  %v3712_v59 = vld [vmem:[#allocation2 + $0xa8] sm:$0xf] }
  0x67   : > { %1146 = vmatpush.bf16.msra.mxu2 %v3645_v20  ;;  %v4893_v60 = vld [vmem:[#allocation2 + $0xb4] sm:$0xf0]  ;;  %v3840_v61 = vld [vmem:[#allocation2 + $0x1a8] sm:$0xf]  ;;  %v3861_v62 = vor.u32 %v4927_v54, %v3858_v55  ;;  %v4891_v0 = vld [vmem:[#allocation2 + $0xac] sm:$0xf] }
  0x68   : > { %1159 = vmatpush.bf16.msra.mxu3 %v3773_v24  ;;  %v4925_v63 = vld [vmem:[#allocation2 + $0x1b4] sm:$0xf0]  ;;  %v3714_v1 = vld [vmem:[#allocation2 + $0xb8] sm:$0xf0]  ;;  %v4923_v2 = vld [vmem:[#allocation2 + $0x1ac] sm:$0xf]  ;;  %v3713_v4 = vor.u32 %v4893_v60, %v3712_v59 }
  0x69   : > { %1121 = vmatpush.bf16.msra.mxu0 %v3625_v31  ;;  %v3842_v3 = vld [vmem:[#allocation2 + $0x1b8] sm:$0xf0]  ;;  %v3841_v5 = vor.u32 %v4925_v63, %v3840_v61  ;;  %v3717_v6 = vor.u32 %v4891_v0, %v3714_v1  ;;  %v3696_v7 = vld [vmem:[#allocation2 + $0x88] sm:$0xf]  ;;  %v4889_v8 = vld [vmem:[#allocation2 + $0x94] sm:$0xf0] }
  0x6a   : > { %1134 = vmatpush.bf16.msra.mxu1 %v3753_v35  ;;  %v3824_v9 = vld [vmem:[#allocation2 + $0x188] sm:$0xf]  ;;  %v3845_v10 = vor.u32 %v4923_v2, %v3842_v3  ;;  %v4921_v11 = vld [vmem:[#allocation2 + $0x194] sm:$0xf0]  ;;  %v4887_v12 = vld [vmem:[#allocation2 + $0x8c] sm:$0xf]  ;;  %v3697_v16 = vor.u32 %v4889_v8, %v3696_v7 }
  0x6b   : > { %1147 = vmatpush.bf16.msra.mxu2 %v3629_v36  ;;  %v3698_v13 = vld [vmem:[#allocation2 + $0x98] sm:$0xf0]  ;;  %v4919_v14 = vld [vmem:[#allocation2 + $0x18c] sm:$0xf]  ;;  %v3825_v17 = vor.u32 %v4921_v11, %v3824_v9  ;;  %v3680_v19 = vld [vmem:[#allocation2 + $0x68] sm:$0xf] }
  0x6c   : > { %1160 = vmatpush.bf16.msra.mxu3 %v3757_v40  ;;  %1122 = vmatmul.bf16.vlgmr.msra.gmra.mxu0 %v5964_v49  ;;  %v3826_v15 = vld [vmem:[#allocation2 + $0x198] sm:$0xf0]  ;;  %v3701_v18 = vor.u32 %v4887_v12, %v3698_v13  ;;  %v4885_v20 = vld [vmem:[#allocation2 + $0x74] sm:$0xf0]  ;;  %v3808_v21 = vld [vmem:[#allocation2 + $0x168] sm:$0xf] }
  0x6d   : > { %1166 = vmatpush.bf16.msrb.mxu0 %v3745_v41  ;;  %1135 = vmatmul.bf16.vlgmr.msra.gmra.mxu1 %v5966_v53  ;;  %v3829_v22 = vor.u32 %v4919_v14, %v3826_v15  ;;  %v4917_v23 = vld [vmem:[#allocation2 + $0x174] sm:$0xf0]  ;;  %v4883_v24 = vld [vmem:[#allocation2 + $0x6c] sm:$0xf]  ;;  %v3682_v25 = vld [vmem:[#allocation2 + $0x78] sm:$0xf0]  ;;  %v3681_v28 = vor.u32 %v4885_v20, %v3680_v19 }
  0x6e   : > { %1179 = vmatpush.bf16.msrb.mxu1 %v3873_v43  ;;  %1148 = vmatmul.bf16.vlgmr.msra.gmra.mxu2 %v5964_v49  ;;  %v4915_v26 = vld [vmem:[#allocation2 + $0x16c] sm:$0xf]  ;;  %v3810_v27 = vld [vmem:[#allocation2 + $0x178] sm:$0xf0]  ;;  %v3809_v29 = vor.u32 %v4917_v23, %v3808_v21  ;;  %v3685_v30 = vor.u32 %v4883_v24, %v3682_v25  ;;  %v3664_v31 = vld [vmem:[#allocation2 + $0x48] sm:$0xf] }
  0x6f   : > { %1192 = vmatpush.bf16.msrb.mxu2 %v3749_v44  ;;  %1161 = vmatmul.bf16.vlgmr.msra.gmra.mxu3 %v5966_v53  ;;  %v4881_v32 = vld [vmem:[#allocation2 + $0x54] sm:$0xf0]  ;;  %v3792_v33 = vld [vmem:[#allocation2 + $0x148] sm:$0xf]  ;;  %v3813_v34 = vor.u32 %v4915_v26, %v3810_v27  ;;  %v4879_v36 = vld [vmem:[#allocation2 + $0x4c] sm:$0xf] }
  0x70   : > { %1205 = vmatpush.bf16.msrb.mxu3 %v3877_v48  ;;  %v4913_v35 = vld [vmem:[#allocation2 + $0x154] sm:$0xf0]  ;;  %v3666_v37 = vld [vmem:[#allocation2 + $0x58] sm:$0xf0]  ;;  %v4911_v38 = vld [vmem:[#allocation2 + $0x14c] sm:$0xf]  ;;  %v3665_v40 = vor.u32 %v4881_v32, %v3664_v31 }
  0x71   : > { %1167 = vmatpush.bf16.msrb.mxu0 %v3729_v56  ;;  %v3794_v39 = vld [vmem:[#allocation2 + $0x158] sm:$0xf0]  ;;  %v3648_v41 = vld [vmem:[#allocation2 + $0x28] sm:$0xf]  ;;  %v4877_v42 = vld [vmem:[#allocation2 + $0x34] sm:$0xf0]  ;;  %v3793_v44 = vor.u32 %v4913_v35, %v3792_v33  ;;  %v3669_v45 = vor.u32 %v4879_v36, %v3666_v37 }
  0x72   : > { %1180 = vmatpush.bf16.msrb.mxu1 %v3857_v57  ;;  %v3776_v43 = vld [vmem:[#allocation2 + $0x128] sm:$0xf]  ;;  %v3797_v46 = vor.u32 %v4911_v38, %v3794_v39  ;;  %v4909_v47 = vld [vmem:[#allocation2 + $0x134] sm:$0xf0]  ;;  %v4875_v48 = vld [vmem:[#allocation2 + $0x2c] sm:$0xf]  ;;  %v3649_v54 = vor.u32 %v4877_v42, %v3648_v41 }
  0x73   : > { %1193 = vmatpush.bf16.msrb.mxu2 %v3733_v58  ;;  %v3650_v50 = vld [vmem:[#allocation2 + $0x38] sm:$0xf0]  ;;  %v4907_v51 = vld [vmem:[#allocation2 + $0x12c] sm:$0xf]  ;;  %v3632_v55 = vld [vmem:[#allocation2 + $0x8] sm:$0xf]  ;;  %v3777_v56 = vor.u32 %v4909_v47, %v3776_v43 }
  0x74   : > { %1206 = vmatpush.bf16.msrb.mxu3 %v3861_v62  ;;  %v3778_v52 = vld [vmem:[#allocation2 + $0x138] sm:$0xf0]  ;;  %v3653_v57 = vor.u32 %v4875_v48, %v3650_v50  ;;  %v4873_v58 = vld [vmem:[#allocation2 + $0x14] sm:$0xf0]  ;;  %v3760_v59 = vld [vmem:[#allocation2 + $0x108] sm:$0xf] }
  0x75   : > { %1168 = vmatpush.bf16.msrb.mxu0 %v3713_v4  ;;  %v4905_v60 = vld [vmem:[#allocation2 + $0x114] sm:$0xf0]  ;;  %v3781_v61 = vor.u32 %v4907_v51, %v3778_v52  ;;  %v4871_v62 = vld [vmem:[#allocation2 + $0xc] sm:$0xf]  ;;  %v3634_v63 = vld [vmem:[#allocation2 + $0x18] sm:$0xf0]  ;;  %v3633_v4 = vor.u32 %v4873_v58, %v3632_v55 }
  0x76   : > { %1181 = vmatpush.bf16.msrb.mxu1 %v3841_v5  ;;  %v4903_v0 = vld [vmem:[#allocation2 + $0x10c] sm:$0xf]  ;;  %v3762_v1 = vld [vmem:[#allocation2 + $0x118] sm:$0xf0]  ;;  %v3936_v2 = vld [vmem:[#allocation7 + $0x70] sm:$0xf]  ;;  %v3761_v7 = vor.u32 %v4905_v60, %v3760_v59  ;;  %v3637_v8 = vor.u32 %v4871_v62, %v3634_v63 }
  0x77   : > { %1194 = vmatpush.bf16.msrb.mxu2 %v3717_v6  ;;  %v4949_v3 = vld [vmem:[#allocation7 + $0x74] sm:$0xf0]  ;;  %v4000_v5 = vld [vmem:[#allocation7 + $0xf0] sm:$0xf]  ;;  %v3765_v9 = vor.u32 %v4903_v0, %v3762_v1  ;;  %v3928_v13 = vld [vmem:[#allocation7 + $0x60] sm:$0xf] }
  0x78   : > { %1207 = vmatpush.bf16.msrb.mxu3 %v3845_v10  ;;  %v4965_v6 = vld [vmem:[#allocation7 + $0xf4] sm:$0xf0]  ;;  %v3937_v10 = vor.u32 %v4949_v3, %v3936_v2  ;;  %v4064_v11 = vld [vmem:[#allocation7 + $0x170] sm:$0xf]  ;;  %v4947_v14 = vld [vmem:[#allocation7 + $0x64] sm:$0xf0] }
  0x79   : > { %1169 = vmatpush.bf16.msrb.mxu0 %v3697_v16  ;;  %v4981_v12 = vld [vmem:[#allocation7 + $0x174] sm:$0xf0]  ;;  %v4001_v15 = vor.u32 %v4965_v6, %v4000_v5  ;;  %v3992_v16 = vld [vmem:[#allocation7 + $0xe0] sm:$0xf]  ;;  %v3929_v19 = vor.u32 %v4947_v14, %v3928_v13  ;;  %v3920_v20 = vld [vmem:[#allocation7 + $0x50] sm:$0xf] }
  0x7a   : > { %1182 = vmatpush.bf16.msrb.mxu1 %v3825_v17  ;;  %v4963_v17 = vld [vmem:[#allocation7 + $0xe4] sm:$0xf0]  ;;  %v4945_v21 = vld [vmem:[#allocation7 + $0x54] sm:$0xf0]  ;;  %v3984_v23 = vld [vmem:[#allocation7 + $0xd0] sm:$0xf] }
  0x7b   : > { %1195 = vmatpush.bf16.msrb.mxu2 %v3701_v18  ;;  %v4065_v18 = vor.u32 %v4981_v12, %v4064_v11  ;;  %v4961_v24 = vld [vmem:[#allocation7 + $0xd4] sm:$0xf0]  ;;  %v3921_v25 = vor.u32 %v4945_v21, %v3920_v20  ;;  %v3912_v26 = vld [vmem:[#allocation7 + $0x40] sm:$0xf]  ;;  %v4943_v27 = vld [vmem:[#allocation7 + $0x44] sm:$0xf0] }
  0x7c   : > { %1208 = vmatpush.bf16.msrb.mxu3 %v3829_v22  ;;  %v3993_v22 = vor.u32 %v4963_v17, %v3992_v16  ;;  %v3913_v31 = vor.u32 %v4943_v27, %v3912_v26  ;;  %v3904_v32 = vld [vmem:[#allocation7 + $0x30] sm:$0xf]  ;;  %v4941_v33 = vld [vmem:[#allocation7 + $0x34] sm:$0xf0]  ;;  %v4939_v37 = vld [vmem:[#allocation7 + $0x24] sm:$0xf0] }
  0x7d   : > { %1170 = vmatpush.bf16.msrb.mxu0 %v3681_v28  ;;  %v3985_v28 = vor.u32 %v4961_v24, %v3984_v23  ;;  %v4957_v35 = vld [vmem:[#allocation7 + $0xb4] sm:$0xf0]  ;;  %v3905_v36 = vor.u32 %v4941_v33, %v3904_v32  ;;  %v3960_v39 = vld [vmem:[#allocation7 + $0xa0] sm:$0xf]  ;;  %v3888_v42 = vld [vmem:[#allocation7 + $0x10] sm:$0xf] }
  0x7e   : > { %1183 = vmatpush.bf16.msrb.mxu1 %v3809_v29  ;;  %v3976_v29 = vld [vmem:[#allocation7 + $0xc0] sm:$0xf]  ;;  %v4937_v43 = vld [vmem:[#allocation7 + $0x14] sm:$0xf0]  ;;  %v4935_v47 = vld [vmem:[#allocation7 + $0x4] sm:$0xf0] }
  0x7f   : > { %1196 = vmatpush.bf16.msrb.mxu2 %v3685_v30  ;;  %v4959_v30 = vld [vmem:[#allocation7 + $0xc4] sm:$0xf0]  ;;  %v4948_v48 = vld [vmem:[#allocation7 + $0x74] sm:$0xf]  ;;  %v3938_v50 = vld [vmem:[#allocation7 + $0x78] sm:$0xf0] }
  0x80   : > { %1209 = vmatpush.bf16.msrb.mxu3 %v3813_v34  ;;  %v3977_v34 = vor.u32 %v4959_v30, %v3976_v29  ;;  %v3941_v52 = vor.u32 %v4948_v48, %v3938_v50  ;;  %v4953_v55 = vld [vmem:[#allocation7 + $0x94] sm:$0xf0]  ;;  %v4979_v58 = vld [vmem:[#allocation7 + $0x164] sm:$0xf0]  ;;  %v4946_v59 = vld [vmem:[#allocation7 + $0x64] sm:$0xf] }
  0x81   : > { %1171 = vmatpush.bf16.msrb.mxu0 %v3665_v40  ;;  %v4955_v40 = vld [vmem:[#allocation7 + $0xa4] sm:$0xf0]  ;;  %v3944_v62 = vld [vmem:[#allocation7 + $0x80] sm:$0xf]  ;;  %v4128_v2 = vld [vmem:[#allocation7 + $0x1f0] sm:$0xf] }
  0x82   : > { %1184 = vmatpush.bf16.msrb.mxu1 %v3793_v44  ;;  %v3961_v44 = vor.u32 %v4955_v40, %v3960_v39  ;;  %v4951_v63 = vld [vmem:[#allocation7 + $0x84] sm:$0xf0]  ;;  %v4997_v3 = vld [vmem:[#allocation7 + $0x1f4] sm:$0xf0]  ;;  %v4002_v6 = vld [vmem:[#allocation7 + $0xf8] sm:$0xf0] }
  0x83   : > { %1197 = vmatpush.bf16.msrb.mxu2 %v3669_v45  ;;  %v3889_v45 = vor.u32 %v4937_v43, %v3888_v42  ;;  %v3945_v1 = vor.u32 %v4951_v63, %v3944_v62  ;;  %v4129_v5 = vor.u32 %v4997_v3, %v4128_v2  ;;  %v3922_v12 = vld [vmem:[#allocation7 + $0x58] sm:$0xf0]  ;;  %v4120_v14 = vld [vmem:[#allocation7 + $0x1e0] sm:$0xf]  ;;  %v4962_v16 = vld [vmem:[#allocation7 + $0xe4] sm:$0xf] }
  0x84   : > { %1210 = vmatpush.bf16.msrb.mxu3 %v3797_v46  ;;  %v3880_v46 = vld [vmem:[#allocation7] sm:$0xf]  ;;  %v4975_v21 = vld [vmem:[#allocation7 + $0x144] sm:$0xf0]  ;;  %v3914_v24 = vld [vmem:[#allocation7 + $0x48] sm:$0xf0] }
  0x85   : > { %1172 = vmatpush.bf16.msrb.mxu0 %v3649_v54  ;;  %v3881_v51 = vor.u32 %v4935_v47, %v3880_v46  ;;  %v3952_v54 = vld [vmem:[#allocation7 + $0x90] sm:$0xf]  ;;  %v4040_v20 = vld [vmem:[#allocation7 + $0x140] sm:$0xf]  ;;  %v4993_v27 = vld [vmem:[#allocation7 + $0x1d4] sm:$0xf0] }
  0x86   : > { %1185 = vmatpush.bf16.msrb.mxu1 %v3777_v56  ;;  %v3953_v56 = vor.u32 %v4953_v55, %v3952_v54  ;;  %v4041_v23 = vor.u32 %v4975_v21, %v4040_v20  ;;  %v4112_v26 = vld [vmem:[#allocation7 + $0x1d0] sm:$0xf]  ;;  %v3986_v30 = vld [vmem:[#allocation7 + $0xd8] sm:$0xf0]  ;;  %v4973_v33 = vld [vmem:[#allocation7 + $0x134] sm:$0xf0] }
  0x87   : > { %1198 = vmatpush.bf16.msrb.mxu2 %v3653_v57  ;;  %v4056_v57 = vld [vmem:[#allocation7 + $0x160] sm:$0xf]  ;;  %v4113_v29 = vor.u32 %v4993_v27, %v4112_v26  ;;  %v4032_v32 = vld [vmem:[#allocation7 + $0x130] sm:$0xf]  ;;  %v3978_v40 = vld [vmem:[#allocation7 + $0xc8] sm:$0xf0] }
  0x88   : > { %1211 = vmatpush.bf16.msrb.mxu3 %v3781_v61  ;;  %v4057_v60 = vor.u32 %v4979_v58, %v4056_v57  ;;  %v3930_v61 = vld [vmem:[#allocation7 + $0x68] sm:$0xf0]  ;;  %v4024_v42 = vld [vmem:[#allocation7 + $0x120] sm:$0xf]  ;;  %v4971_v43 = vld [vmem:[#allocation7 + $0x124] sm:$0xf0] }
  0x89   : > { %1173 = vmatpush.bf16.msrb.mxu0 %v3633_v4  ;;  %v3933_v0 = vor.u32 %v4946_v59, %v3930_v61  ;;  %v4964_v4 = vld [vmem:[#allocation7 + $0xf4] sm:$0xf]  ;;  %v3898_v46 = vld [vmem:[#allocation7 + $0x28] sm:$0xf0]  ;;  %v4096_v48 = vld [vmem:[#allocation7 + $0x1b0] sm:$0xf] }
  0x8a   : > { %1186 = vmatpush.bf16.msrb.mxu1 %v3761_v7  ;;  %v4005_v7 = vor.u32 %v4964_v4, %v4002_v6  ;;  %v4989_v50 = vld [vmem:[#allocation7 + $0x1b4] sm:$0xf0]  ;;  %v3970_v54 = vld [vmem:[#allocation7 + $0xb8] sm:$0xf0]  ;;  %v4016_v55 = vld [vmem:[#allocation7 + $0x110] sm:$0xf] }
  0x8b   : > { %1199 = vmatpush.bf16.msrb.mxu2 %v3637_v8  ;;  %v4048_v8 = vld [vmem:[#allocation7 + $0x150] sm:$0xf]  ;;  %v4936_v59 = vld [vmem:[#allocation7 + $0x14] sm:$0xf]  ;;  %v4088_v61 = vld [vmem:[#allocation7 + $0x1a0] sm:$0xf] }
  0x8c   : > { %1212 = vmatpush.bf16.msrb.mxu3 %v3765_v9  ;;  %1174 = vmatmul.bf16.vlgmr.msrb.gmra.mxu0 %v5964_v49  ;;  %v4977_v9 = vld [vmem:[#allocation7 + $0x154] sm:$0xf0]  ;;  %v4987_v63 = vld [vmem:[#allocation7 + $0x1a4] sm:$0xf0]  ;;  %v4008_v4 = vld [vmem:[#allocation7 + $0x100] sm:$0xf] }
  0x8d   : > { %1616 = vmatpush.bf16.msra.mxu0 %v3937_v10  ;;  %1187 = vmatmul.bf16.vlgmr.msrb.gmra.mxu1 %v5966_v53  ;;  %v4944_v10 = vld [vmem:[#allocation7 + $0x54] sm:$0xf]  ;;  %v4049_v11 = vor.u32 %v4977_v9, %v4048_v8  ;;  %v4089_v2 = vor.u32 %v4987_v63, %v4088_v61  ;;  %v4934_v6 = vld [vmem:[#allocation7 + $0x4] sm:$0xf]  ;;  %v3882_v8 = vld [vmem:[#allocation7 + $0x8] sm:$0xf0] }
  0x8e   : > { %1629 = vmatpush.bf16.msra.mxu1 %v4001_v15  ;;  %1200 = vmatmul.bf16.vlgmr.msrb.gmra.mxu2 %v5964_v49  ;;  %v3968_v49 = vld [vmem:[#allocation7 + $0xb0] sm:$0xf]  ;;  %v3925_v13 = vor.u32 %v4944_v10, %v3922_v12  ;;  %v4995_v15 = vld [vmem:[#allocation7 + $0x1e4] sm:$0xf0]  ;;  %v4980_v9 = vld [vmem:[#allocation7 + $0x174] sm:$0xf]  ;;  %v3885_v12 = vor.u32 %v4934_v6, %v3882_v8 }
  0x8f   : > { %1213 = vmatmul.bf16.vlgmr.msrb.gmra.mxu3 %v5966_v53  ;;  %1642 = vmatpush.bf16.msra.mxu2 %v4065_v18  ;;  %v3896_v53 = vld [vmem:[#allocation7 + $0x20] sm:$0xf]  ;;  %v3969_v38 = vor.u32 %v4957_v35, %v3968_v49  ;;  %v4121_v17 = vor.u32 %v4995_v15, %v4120_v14  ;;  %v3994_v18 = vld [vmem:[#allocation7 + $0xe8] sm:$0xf0]  ;;  %v4033_v49 = vor.u32 %v4973_v33, %v4032_v32  ;;  %v3906_v35 = vld [vmem:[#allocation7 + $0x38] sm:$0xf0] }
  0x90   : > { %v3897_v41 = vor.u32 %v4939_v37, %v3896_v53  ;;  %1655 = vmatpush.bf16.msra.mxu3 %v4129_v5  ;;  %v4104_v53 = vld [vmem:[#allocation7 + $0x1c0] sm:$0xf]  ;;  %v4991_v37 = vld [vmem:[#allocation7 + $0x1c4] sm:$0xf0]  ;;  %v4066_v10 = vld [vmem:[#allocation7 + $0x178] sm:$0xf0] }
  0x91   : > { %1617 = vmatpush.bf16.msra.mxu0 %v3929_v19  ;;  %v3997_v19 = vor.u32 %v4962_v16, %v3994_v18  ;;  %v4105_v39 = vor.u32 %v4991_v37, %v4104_v53  ;;  %v4967_v5 = vld [vmem:[#allocation7 + $0x104] sm:$0xf0]  ;;  %v4080_v14 = vld [vmem:[#allocation7 + $0x190] sm:$0xf]  ;;  %v4985_v15 = vld [vmem:[#allocation7 + $0x194] sm:$0xf0] }
  0x92   : > { %1630 = vmatpush.bf16.msra.mxu1 %v3993_v22  ;;  %v4942_v22 = vld [vmem:[#allocation7 + $0x44] sm:$0xf]  ;;  %v4952_v16 = vld [vmem:[#allocation7 + $0x94] sm:$0xf]  ;;  %v4081_v18 = vor.u32 %v4985_v15, %v4080_v14  ;;  %v4983_v26 = vld [vmem:[#allocation7 + $0x184] sm:$0xf0] }
  0x93   : > { %1643 = vmatpush.bf16.msra.mxu2 %v4057_v60  ;;  %v3890_v60 = vld [vmem:[#allocation7 + $0x18] sm:$0xf0]  ;;  %v4978_v21 = vld [vmem:[#allocation7 + $0x164] sm:$0xf]  ;;  %v4996_v32 = vld [vmem:[#allocation7 + $0x1f4] sm:$0xf] }
  0x94   : > { %1656 = vmatpush.bf16.msra.mxu3 %v4121_v17  ;;  %v3893_v62 = vor.u32 %v4936_v59, %v3890_v60  ;;  %v4950_v27 = vld [vmem:[#allocation7 + $0x84] sm:$0xf]  ;;  %v4130_v33 = vld [vmem:[#allocation7 + $0x1f8] sm:$0xf0]  ;;  %v4090_v15 = vld [vmem:[#allocation7 + $0x1a8] sm:$0xf0] }
  0x95   : > { %1618 = vmatpush.bf16.msra.mxu0 %v3921_v25  ;;  %v3917_v25 = vor.u32 %v4942_v22, %v3914_v24  ;;  %v4058_v22 = vld [vmem:[#allocation7 + $0x168] sm:$0xf0]  ;;  %v4050_v53 = vld [vmem:[#allocation7 + $0x158] sm:$0xf0]  ;;  %v4990_v61 = vld [vmem:[#allocation7 + $0x1c4] sm:$0xf] }
  0x96   : > { %1631 = vmatpush.bf16.msra.mxu1 %v3985_v28  ;;  %v4960_v28 = vld [vmem:[#allocation7 + $0xd4] sm:$0xf]  ;;  %v4061_v24 = vor.u32 %v4978_v21, %v4058_v22  ;;  %v4098_v6 = vld [vmem:[#allocation7 + $0x1b8] sm:$0xf0]  ;;  %s707_s18 = sand.u32 1, %s6321_s20   ;;  %s6322_s23 = sld [smem:[#allocation38_spill]] }
  0x97   : > { %1644 = vmatpush.bf16.msra.mxu2 %v4049_v11  ;;  %v5976_v11 = vld [vmem:[#allocation5] sm:$0xf]  ;;  %s3619_s30 = sshll.u32 %s707_s18, 3  ;;  %s3435_s2 = scalar_lea.sflag [#allocation4], %s707_s18 }
  0x98   : > { %1657 = vmatpush.bf16.msra.mxu3 %v4113_v29  ;;  %v786_v17 = vperm.slane %v5976_v11, 0  ;;  %v787_v37 = vperm.slane %v5976_v11, 1  ;;  %s709_s0 = scalar_lea.vmem [#allocation17], %s3619_s30 }
  0x99   : > { %1619 = vmatpush.bf16.msra.mxu0 %v3913_v31  ;;  %v3989_v31 = vor.u32 %v4960_v28, %v3986_v30  ;;  %s3447_s29 = sshll.u32 %s709_s0, 4  ;;  %s3448_s29 = int_to_ptr.vmem [resolvable:$true] %s3447_s29 }
  0x9a   : > { %1632 = vmatpush.bf16.msra.mxu1 %v3977_v34  ;;  %v4940_v34 = vld [vmem:[#allocation7 + $0x34] sm:$0xf] }
  0x9b   : > { %1645 = vmatpush.bf16.msra.mxu2 %v4041_v23 }
  0x9c   : > { %1658 = vmatpush.bf16.msra.mxu3 %v4105_v39  ;;  %v4994_v39 = vld [vmem:[#allocation7 + $0x1e4] sm:$0xf]  ;;  %s3445_s21 = scalar_lea.hbm %s6322_s23, %s4866_s19  ;;  %s5642_s28 = scalar_lea.hbm %s6322_s23, 16 }
  0x9d   : > { %1620 = vmatpush.bf16.msra.mxu0 %v3905_v36  ;;  %v3909_v36 = vor.u32 %v4940_v34, %v3906_v35  ;;  %s3449_s6 = sshll.u32 %s3445_s21, 4  ;;  %s3450_s6 = int_to_ptr.hbm [resolvable:$true] %s3449_s6 }
  0x9e   : > { %1633 = vmatpush.bf16.msra.mxu1 %v3969_v38  ;;  %v4958_v38 = vld [vmem:[#allocation7 + $0xc4] sm:$0xf]  ;;  %s5636_s25 = sshra.s32 %s3450_s6, 4  ;;  %s5637_s25 = int_to_ptr.hbm [resolvable:$true] %s5636_s25 }
  0x9f   : > { %1646 = vmatpush.bf16.msra.mxu2 %v4033_v49  ;;  %v4133_v49 = vor.u32 %v4996_v32, %v4130_v33  ;;  %v4332_v32 = vld [vmem:[#allocation10 + $0x188] sm:$0xf]  ;;  %v5050_v33 = vld [vmem:[#allocation10 + $0x1a0] sm:$0xf0]  ;;  %s5638_s26 = scalar_lea.hbm %s5637_s25, 8  ;;  %p5643_p3 = scmp.lt.s32.totalorder %s5637_s25, %s6322_s23 }
  0xa0   : > { %p5639_p0 = scmp.ne.s32.totalorder %s5637_s25, %s5638_s26  ;;  %p5644_p4 = scmp.lt.s32.totalorder %s5642_s28, %s5638_s26 }
  0xa1   : > { %1621 = vmatpush.bf16.msra.mxu0 %v3897_v41  ;;  %v3981_v41 = vor.u32 %v4958_v38, %v3978_v40  ;;  %v4122_v40 = vld [vmem:[#allocation7 + $0x1e8] sm:$0xf0] }
  0xa2   : > { %1634 = vmatpush.bf16.msra.mxu1 %v3961_v44  ;;  %v4938_v44 = vld [vmem:[#allocation7 + $0x24] sm:$0xf]  ;;  %p5640_p1 = pnand %p5639_p0, %p5858_p5  ;;  %p5645_p7 = por %p5644_p4, %p5643_p3 }
  0xa3   : > { %v3901_v47 = vor.u32 %v4938_v44, %v3898_v46  ;;  %v4042_v44 = vld [vmem:[#allocation7 + $0x148] sm:$0xf0] }
  0xa4   : > { %p5641_p2 = pneg %p5640_p1 }
  0xa5   : > { %1622 = vmatpush.bf16.msra.mxu0 %v3889_v45  ;;  %v4025_v45 = vor.u32 %v4971_v43, %v4024_v42  ;;  %v4974_v43 = vld [vmem:[#allocation7 + $0x144] sm:$0xf] }
  0xa6   : > { %1635 = vmatpush.bf16.msra.mxu1 %v3953_v56  ;;  %v4969_v56 = vld [vmem:[#allocation7 + $0x114] sm:$0xf0]  ;;  %p5646_p8 = pnand %p5645_p7, %p5641_p2 }
  0xa7   : > { %1647 = vmatpush.bf16.msra.mxu2 %v4025_v45  ;;  %v4017_v58 = vor.u32 %v4969_v56, %v4016_v55 }
  0xa9   : > { %1623 = vmatpush.bf16.msra.mxu0 %v3881_v51  ;;  %v4956_v51 = vld [vmem:[#allocation7 + $0xb4] sm:$0xf] }
  0xaa   : > { %1636 = vmatpush.bf16.msra.mxu1 %v3945_v1  ;;  %v3973_v57 = vor.u32 %v4956_v51, %v3970_v54  ;;  %v3962_v1 = vld [vmem:[#allocation7 + $0xa8] sm:$0xf0]  ;;  %v4992_v51 = vld [vmem:[#allocation7 + $0x1d4] sm:$0xf] }
  0xab   : > { %1648 = vmatpush.bf16.msra.mxu2 %v4017_v58  ;;  %v4034_v58 = vld [vmem:[#allocation7 + $0x138] sm:$0xf0] }
  0xad   : > { %1668 = vmatpush.bf16.msrb.mxu0 %v3941_v52  ;;  %v4097_v52 = vor.u32 %v4989_v50, %v4096_v48  ;;  %v4045_v48 = vor.u32 %v4974_v43, %v4042_v44 }
  0xae   : > { %1681 = vmatpush.bf16.msrb.mxu1 %v4005_v7  ;;  %v4009_v7 = vor.u32 %v4967_v5, %v4008_v4  ;;  %v4988_v5 = vld [vmem:[#allocation7 + $0x1b4] sm:$0xf] }
  0xaf   : > { %1659 = vmatpush.bf16.msra.mxu3 %v4097_v52  ;;  %v4114_v52 = vld [vmem:[#allocation7 + $0x1d8] sm:$0xf0]  ;;  %v4101_v8 = vor.u32 %v4988_v5, %v4098_v6  ;;  %v4556_v5 = vld [vmem:[#allocation10 + $0x348] sm:$0xf] }
  0xb0   : > { %1649 = vmatpush.bf16.msra.mxu2 %v4009_v7  ;;  %v4117_v55 = vor.u32 %v4992_v51, %v4114_v52  ;;  %v5040_v51 = vld [vmem:[#allocation10 + $0x154] sm:$0xf]  ;;  %v4306_v52 = vld [vmem:[#allocation10 + $0x16c] sm:$0xf0] }
  0xb1   : > { %1669 = vmatpush.bf16.msrb.mxu0 %v3933_v0  ;;  %v4954_v0 = vld [vmem:[#allocation7 + $0xa4] sm:$0xf] }
  0xb2   : > { %1682 = vmatpush.bf16.msrb.mxu1 %v3997_v19  ;;  %v3965_v3 = vor.u32 %v4954_v0, %v3962_v1  ;;  %v3954_v19 = vld [vmem:[#allocation7 + $0x98] sm:$0xf0]  ;;  %v4970_v1 = vld [vmem:[#allocation7 + $0x124] sm:$0xf] }
  0xb3   : > { %1660 = vmatpush.bf16.msra.mxu3 %v4089_v2  ;;  %v3957_v20 = vor.u32 %v4952_v16, %v3954_v19  ;;  %v4026_v2 = vld [vmem:[#allocation7 + $0x128] sm:$0xf0]  ;;  %v4966_v16 = vld [vmem:[#allocation7 + $0x104] sm:$0xf]  ;;  %v4984_v19 = vld [vmem:[#allocation7 + $0x194] sm:$0xf] }
  0xb4   : > { %v4029_v4 = vor.u32 %v4970_v1, %v4026_v2  ;;  %v4250_v1 = vld [vmem:[#allocation10 + $0xfc] sm:$0xf0] }
  0xb5   : > { %1670 = vmatpush.bf16.msrb.mxu0 %v3925_v13  ;;  %v4069_v13 = vor.u32 %v4980_v9, %v4066_v10  ;;  %v4968_v9 = vld [vmem:[#allocation7 + $0x114] sm:$0xf]  ;;  %v4018_v10 = vld [vmem:[#allocation7 + $0x118] sm:$0xf0] }
  0xb6   : > { %1683 = vmatpush.bf16.msrb.mxu1 %v3989_v31  ;;  %v3946_v31 = vld [vmem:[#allocation7 + $0x88] sm:$0xf0]  ;;  %v4021_v14 = vor.u32 %v4968_v9, %v4018_v10 }
  0xb7   : > { %1694 = vmatpush.bf16.msrb.mxu2 %v4069_v13  ;;  %1661 = vmatpush.bf16.msra.mxu3 %v4081_v18  ;;  %v3949_v34 = vor.u32 %v4950_v27, %v3946_v31  ;;  %v789_v31 = vperm.slane %v5976_v11, 3  ;;  %v4222_v9 = vld [vmem:[#allocation10 + $0xc4] sm:$0xf0] }
  0xb9   : > { %1671 = vmatpush.bf16.msrb.mxu0 %v3917_v25  ;;  %v4072_v25 = vld [vmem:[#allocation7 + $0x180] sm:$0xf] }
  0xba   : > { %1684 = vmatpush.bf16.msrb.mxu1 %v3981_v41  ;;  %v4073_v30 = vor.u32 %v4983_v26, %v4072_v25  ;;  %v4125_v41 = vor.u32 %v4994_v39, %v4122_v40  ;;  %v4074_v25 = vld [vmem:[#allocation7 + $0x188] sm:$0xf0] }
  0xbb   : > { %1695 = vmatpush.bf16.msrb.mxu2 %v4061_v24  ;;  %v4982_v24 = vld [vmem:[#allocation7 + $0x184] sm:$0xf]  ;;  %v5047_v39 = vld [vmem:[#allocation10 + $0x18c] sm:$0xf]  ;;  %v4334_v40 = vld [vmem:[#allocation10 + $0x1a4] sm:$0xf0] }
  0xbc   : > { %1662 = vmatpush.bf16.msra.mxu3 %v4073_v30  ;;  %v4077_v26 = vor.u32 %v4982_v24, %v4074_v25  ;;  %v5096_v24 = vld [vmem:[#allocation10 + $0x314] sm:$0xf]  ;;  %v4530_v25 = vld [vmem:[#allocation10 + $0x32c] sm:$0xf0] }
  0xbd   : > { %1672 = vmatpush.bf16.msrb.mxu0 %v3909_v36  ;;  %v4976_v36 = vld [vmem:[#allocation7 + $0x154] sm:$0xf] }
  0xbe   : > { %1685 = vmatpush.bf16.msrb.mxu1 %v3973_v57  ;;  %v4053_v38 = vor.u32 %v4976_v36, %v4050_v53  ;;  %v4972_v57 = vld [vmem:[#allocation7 + $0x134] sm:$0xf] }
  0xbf   : > { %v4037_v60 = vor.u32 %v4972_v57, %v4034_v58  ;;  %v5033_v57 = vld [vmem:[#allocation10 + $0x11c] sm:$0xf] }
  0xc0   : > { %1707 = vmatpush.bf16.msrb.mxu3 %v4133_v49  ;;  %1696 = vmatpush.bf16.msrb.mxu2 %v4053_v38  ;;  %v4304_v49 = vld [vmem:[#allocation10 + $0x150] sm:$0xf] }
  0xc1   : > { %1673 = vmatpush.bf16.msrb.mxu0 %v3901_v47 }
  0xc2   : > { %1686 = vmatpush.bf16.msrb.mxu1 %v3965_v3 }
  0xc4   : > { %1708 = vmatpush.bf16.msrb.mxu3 %v4125_v41  ;;  %1697 = vmatpush.bf16.msrb.mxu2 %v4045_v48 }
  0xc5   : > { %1674 = vmatpush.bf16.msrb.mxu0 %v3893_v62  ;;  %v4106_v62 = vld [vmem:[#allocation7 + $0x1c8] sm:$0xf0] }
  0xc6   : > { %1687 = vmatpush.bf16.msrb.mxu1 %v3957_v20  ;;  %v4109_v63 = vor.u32 %v4990_v61, %v4106_v62  ;;  %v4082_v20 = vld [vmem:[#allocation7 + $0x198] sm:$0xf0]  ;;  %v4248_v61 = vld [vmem:[#allocation10 + $0xe0] sm:$0xf] }
  0xc7   : > { %v4085_v22 = vor.u32 %v4984_v19, %v4082_v20  ;;  %v5029_v62 = vld [vmem:[#allocation10 + $0xf8] sm:$0xf0]  ;;  %v5099_v20 = vld [vmem:[#allocation10 + $0x328] sm:$0xf0] }
  0xc8   : > { %1709 = vmatpush.bf16.msrb.mxu3 %v4117_v55  ;;  %1698 = vmatpush.bf16.msrb.mxu2 %v4037_v60  ;;  %v4276_v55 = vld [vmem:[#allocation10 + $0x118] sm:$0xf] }
  0xc9   : > { %1675 = vmatpush.bf16.msrb.mxu0 %v3885_v12  ;;  %v4986_v12 = vld [vmem:[#allocation7 + $0x1a4] sm:$0xf] }
  0xca   : > { %1688 = vmatpush.bf16.msrb.mxu1 %v3949_v34  ;;  %v4093_v18 = vor.u32 %v4986_v12, %v4090_v15  ;;  %v4333_v34 = vor.u32 %v5050_v33, %v4332_v32  ;;  %v5092_v32 = vld [vmem:[#allocation10 + $0x2f0] sm:$0xf0]  ;;  %v5005_v33 = vld [vmem:[#allocation10 + $0x3c] sm:$0xf] }
  0xcc   : > { %1710 = vmatpush.bf16.msrb.mxu3 %v4109_v63  ;;  %1699 = vmatpush.bf16.msrb.mxu2 %v4029_v4  ;;  %v4249_v63 = vor.u32 %v5029_v62, %v4248_v61  ;;  %v5022_v4 = vld [vmem:[#allocation10 + $0xc0] sm:$0xf0]  ;;  %v4446_v61 = vld [vmem:[#allocation10 + $0x284] sm:$0xf0]  ;;  %v4312_v62 = vld [vmem:[#allocation10 + $0x158] sm:$0xf] }
  0xd0   : > { %1711 = vmatpush.bf16.msrb.mxu3 %v4101_v8  ;;  %1700 = vmatpush.bf16.msrb.mxu2 %v4021_v14  ;;  %v5019_v8 = vld [vmem:[#allocation10 + $0xac] sm:$0xf]  ;;  %v4558_v14 = vld [vmem:[#allocation10 + $0x364] sm:$0xf0] }
  0xd1   : > { %v4225_v12 = vor.u32 %v5019_v8, %v4222_v9  ;;  %v5068_v8 = vld [vmem:[#allocation10 + $0x234] sm:$0xf]  ;;  %v4418_v9 = vld [vmem:[#allocation10 + $0x24c] sm:$0xf0] }
  0xd4   : > { %1712 = vmatpush.bf16.msrb.mxu3 %v4093_v18  ;;  %v4528_v18 = vld [vmem:[#allocation10 + $0x310] sm:$0xf] }
  0xd8   : > { %1713 = vmatpush.bf16.msrb.mxu3 %v4085_v22  ;;  %v4529_v22 = vor.u32 %v5099_v20, %v4528_v18  ;;  %v5064_v20 = vld [vmem:[#allocation10 + $0x210] sm:$0xf0] }
  0xdc   : > { %1714 = vmatpush.bf16.msrb.mxu3 %v4077_v26 }
  0xe9   : > { %v1123_v23 = vpop.f32.mrf.mxu0 }
  0xea   : > { %v1124_v28 = vadd.f32 %v1123_v23, %v786_v17  ;;  %v1136_v29 = vpop.f32.mrf.mxu1  ;;  %v4010_v17 = vld [vmem:[#allocation7 + $0x108] sm:$0xf0]  ;;  %v788_v23 = vperm.slane %v5976_v11, 2 }
  0xeb   : > { %v4013_v21 = vor.u32 %v4966_v16, %v4010_v17  ;;  %v4192_v16 = vld [vmem:[#allocation10 + $0x70] sm:$0xf]  ;;  %v5015_v17 = vld [vmem:[#allocation10 + $0x88] sm:$0xf0] }
  0xec   : > { %v1137_v35 = vadd.f32 %v1136_v29, %v1124_v28  ;;  %v4193_v19 = vor.u32 %v5015_v17, %v4192_v16  ;;  %v4286_v16 = vld [vmem:[#allocation10 + $0x13c] sm:$0xf0] }
  0xed   : > { %1701 = vmatpush.bf16.msrb.mxu2 %v4013_v21  ;;  %v5012_v21 = vld [vmem:[#allocation10 + $0x74] sm:$0xf] }
  0xee   : > { %5324 = vtanh.f32 %v1137_v35  ;;  %v5043_v35 = vld [vmem:[#allocation10 + $0x168] sm:$0xf0] }
  0xef   : > { %v4305_v41 = vor.u32 %v5043_v35, %v4304_v49 }
  0xf1   : > { %v1149_v42 = vpop.f32.mrf.mxu2  ;;  %v1125_v47 = vpop.f32.mrf.mxu0 }
  0xf2   : > { %v1150_v45 = vadd.f32 %v1149_v42, %v787_v37  ;;  %v1162_v46 = vpop.f32.mrf.mxu3  ;;  %v1138_v50 = vpop.f32.mrf.mxu1 }
  0xf4   : > { %v1163_v54 = vadd.f32 %v1162_v46, %v1150_v45  ;;  %v5325_v56 = vpop.eup %5324  ;;  %v4337_v45 = vor.u32 %v5047_v39, %v4334_v40  ;;  %v5001_v39 = vld [vmem:[#allocation10 + $0x18] sm:$0xf0]  ;;  %v4472_v40 = vld [vmem:[#allocation10 + $0x2a0] sm:$0xf] }
  0xf5   : > { %v1222_v59 = vpack.c.bf16 %v5325_v56, %v5325_v56  ;;  %v5036_v56 = vld [vmem:[#allocation10 + $0x130] sm:$0xf0] }
  0xf6   : > { %5326 = vtanh.f32 %v1163_v54  ;;  %v4309_v54 = vor.u32 %v5040_v51, %v4306_v52  ;;  %v4277_v58 = vor.u32 %v5036_v56, %v4276_v55  ;;  %v5051_v51 = vld [vmem:[#allocation10 + $0x1a8] sm:$0xf0]  ;;  %v5048_v52 = vld [vmem:[#allocation10 + $0x194] sm:$0xf] }
  0xf7   : > { %1624 = vmatmul.bf16.vlgmr.msra.gmra.mxu0 %v1222_v59 }
  0xf8   : > { %2444 = vmatpush.bf16.msra.mxu0 %v4333_v34  ;;  %v4166_v34 = vld [vmem:[#allocation10 + $0x54] sm:$0xf0] }
  0xf9   : > { %v1151_v0 = vpop.f32.mrf.mxu2  ;;  %v4169_v35 = vor.u32 %v5005_v33, %v4166_v34  ;;  %v5054_v33 = vld [vmem:[#allocation10 + $0x1c4] sm:$0xf] }
  0xfa   : > { %v1164_v3 = vpop.f32.mrf.mxu3  ;;  %v5026_v0 = vld [vmem:[#allocation10 + $0xe4] sm:$0xf] }
  0xfb   : > { %v4253_v2 = vor.u32 %v5026_v0, %v4250_v1  ;;  %v4220_v3 = vld [vmem:[#allocation10 + $0xa8] sm:$0xf] }
  0xfc   : > { %v5327_v7 = vpop.eup %5326  ;;  %2445 = vmatpush.bf16.msra.mxu0 %v4305_v41  ;;  %v4221_v6 = vor.u32 %v5022_v4, %v4220_v3  ;;  %v4314_v3 = vld [vmem:[#allocation10 + $0x174] sm:$0xf0] }
  0xfd   : > { %v1223_v13 = vpack.c.bf16 %v5327_v7, %v5327_v7  ;;  %v5106_v7 = vld [vmem:[#allocation10 + $0x360] sm:$0xf0] }
  0xfe   : > { %v4557_v10 = vor.u32 %v5106_v7, %v4556_v5  ;;  %v4416_v5 = vld [vmem:[#allocation10 + $0x230] sm:$0xf] }
  0xff   : > { %1637 = vmatmul.bf16.vlgmr.msra.gmra.mxu1 %v1223_v13 }
 0x100   : > { %2446 = vmatpush.bf16.msra.mxu0 %v4277_v58  ;;  %2457 = vmatpush.bf16.msra.mxu1 %v4557_v10  ;;  %v5078_v58 = vld [vmem:[#allocation10 + $0x280] sm:$0xf0]  ;;  %v4284_v10 = vld [vmem:[#allocation10 + $0x120] sm:$0xf] }
 0x104   : > { %2447 = vmatpush.bf16.msra.mxu0 %v4249_v63  ;;  %2458 = vmatpush.bf16.msra.mxu1 %v4529_v22  ;;  %v5044_v63 = vld [vmem:[#allocation10 + $0x170] sm:$0xf0]  ;;  %v5061_v22 = vld [vmem:[#allocation10 + $0x1fc] sm:$0xf] }
 0x105   : > { %v4313_v1 = vor.u32 %v5044_v63, %v4312_v62  ;;  %v4172_v63 = vld [vmem:[#allocation10 + $0x40] sm:$0xf] }
 0x107   : > { %1676 = vmatmul.bf16.vlgmr.msrb.gmra.mxu0 %v1222_v59  ;;  %v4278_v59 = vld [vmem:[#allocation10 + $0x134] sm:$0xf0] }
 0x108   : > { %v4281_v60 = vor.u32 %v5033_v57, %v4278_v59  ;;  %2448 = vmatpush.bf16.msra.mxu0 %v4221_v6  ;;  %v4444_v57 = vld [vmem:[#allocation10 + $0x268] sm:$0xf]  ;;  %v5075_v59 = vld [vmem:[#allocation10 + $0x26c] sm:$0xf] }
 0x109   : > { %v1175_v27 = vpop.f32.mrf.mxu0  ;;  %v4449_v0 = vor.u32 %v5075_v59, %v4446_v61  ;;  %v5071_v6 = vld [vmem:[#allocation10 + $0x248] sm:$0xf0]  ;;  %v5097_v59 = vld [vmem:[#allocation10 + $0x31c] sm:$0xf] }
 0x10a   : > { %v1176_v28 = vadd.f32 %v1175_v27, %v788_v23  ;;  %v1188_v29 = vpop.f32.mrf.mxu1  ;;  %v4194_v23 = vld [vmem:[#allocation10 + $0x8c] sm:$0xf0]  ;;  %v4533_v27 = vor.u32 %v5096_v24, %v4530_v25  ;;  %v4417_v7 = vor.u32 %v5071_v6, %v4416_v5  ;;  %v4256_v24 = vld [vmem:[#allocation10 + $0xe8] sm:$0xf]  ;;  %v5006_v5 = vld [vmem:[#allocation10 + $0x44] sm:$0xf] }
 0x10b   : > { %v4197_v26 = vor.u32 %v5012_v21, %v4194_v23  ;;  %v4390_v23 = vld [vmem:[#allocation10 + $0x214] sm:$0xf0]  ;;  %v4174_v6 = vld [vmem:[#allocation10 + $0x5c] sm:$0xf0] }
 0x10c   : > { %v1189_v30 = vadd.f32 %v1188_v29, %v1176_v28  ;;  %2449 = vmatpush.bf16.msra.mxu0 %v4193_v19  ;;  %v4164_v28 = vld [vmem:[#allocation10 + $0x38] sm:$0xf]  ;;  %v5008_v29 = vld [vmem:[#allocation10 + $0x50] sm:$0xf0]  ;;  %v4393_v25 = vor.u32 %v5061_v22, %v4390_v23  ;;  %v5083_v23 = vld [vmem:[#allocation10 + $0x2ac] sm:$0xf] }
 0x10d   : > { %v4388_v19 = vld [vmem:[#allocation10 + $0x1f8] sm:$0xf] }
 0x10e   : > { %5328 = vtanh.f32 %v1189_v30  ;;  %v4500_v30 = vld [vmem:[#allocation10 + $0x2d8] sm:$0xf]  ;;  %v4389_v21 = vor.u32 %v5064_v20, %v4388_v19  ;;  %v4999_v19 = vld [vmem:[#allocation10 + $0xc] sm:$0xf]  ;;  %v4146_v20 = vld [vmem:[#allocation10 + $0x24] sm:$0xf0] }
 0x10f   : > { %1689 = vmatmul.bf16.vlgmr.msrb.gmra.mxu1 %v1223_v13  ;;  %v5103_v13 = vld [vmem:[#allocation10 + $0x34c] sm:$0xf]  ;;  %v4501_v49 = vor.u32 %v5092_v32, %v4500_v30  ;;  %v5057_v32 = vld [vmem:[#allocation10 + $0x1d8] sm:$0xf0]  ;;  %v4149_v22 = vor.u32 %v4999_v19, %v4146_v20  ;;  %v5038_v19 = vld [vmem:[#allocation10 + $0x140] sm:$0xf0] }
 0x110   : > { %v4561_v15 = vor.u32 %v5103_v13, %v4558_v14  ;;  %v4421_v13 = vor.u32 %v5068_v8, %v4418_v9  ;;  %v5037_v14 = vld [vmem:[#allocation10 + $0x138] sm:$0xf0]  ;;  %v4177_v8 = vor.u32 %v5006_v5, %v4174_v6  ;;  %v5090_v9 = vld [vmem:[#allocation10 + $0x2e4] sm:$0xf]  ;;  %v5035_v20 = vld [vmem:[#allocation10 + $0x12c] sm:$0xf] }
 0x111   : > { %v1201_v36 = vpop.f32.mrf.mxu2  ;;  %v1177_v38 = vpop.f32.mrf.mxu0  ;;  %2459 = vmatpush.bf16.msra.mxu1 %v4501_v49  ;;  %v4285_v17 = vor.u32 %v5037_v14, %v4284_v10  ;;  %v4362_v49 = vld [vmem:[#allocation10 + $0x1dc] sm:$0xf0]  ;;  %v4144_v14 = vld [vmem:[#allocation10 + $0x8] sm:$0xf] }
 0x112   : > { %v1202_v53 = vadd.f32 %v1201_v36, %v789_v31  ;;  %v1214_v37 = vpop.f32.mrf.mxu3  ;;  %v1190_v42 = vpop.f32.mrf.mxu1  ;;  %v4165_v31 = vor.u32 %v5008_v29, %v4164_v28  ;;  %v5089_v36 = vld [vmem:[#allocation10 + $0x2dc] sm:$0xf]  ;;  %v4136_v38 = vld [vmem:[#allocation10] sm:$0xf]  ;;  %v4258_v28 = vld [vmem:[#allocation10 + $0x104] sm:$0xf0] }
 0x113   : > { %v4137_v41 = vor.u32 %v5001_v39, %v4136_v38  ;;  %v5085_v42 = vld [vmem:[#allocation10 + $0x2b8] sm:$0xf0]  ;;  %v4564_v38 = vld [vmem:[#allocation10 + $0x350] sm:$0xf]  ;;  %v5107_v39 = vld [vmem:[#allocation10 + $0x368] sm:$0xf0] }
 0x114   : > { %v1215_v43 = vadd.f32 %v1214_v37, %v1202_v53  ;;  %v5329_v44 = vpop.eup %5328  ;;  %v4502_v53 = vld [vmem:[#allocation10 + $0x2f4] sm:$0xf0]  ;;  %2450 = vmatpush.bf16.msra.mxu0 %v4165_v31  ;;  %v4360_v31 = vld [vmem:[#allocation10 + $0x1c0] sm:$0xf] }
 0x115   : > { %v1224_v11 = vpack.c.bf16 %v5329_v44, %v5329_v44  ;;  %v4505_v37 = vor.u32 %v5089_v36, %v4502_v53  ;;  %v4138_v44 = vld [vmem:[#allocation10 + $0x1c] sm:$0xf0]  ;;  %v4361_v34 = vor.u32 %v5057_v32, %v4360_v31  ;;  %v5023_v36 = vld [vmem:[#allocation10 + $0xc8] sm:$0xf0]  ;;  %v5076_v31 = vld [vmem:[#allocation10 + $0x274] sm:$0xf] }
 0x116   : > { %5330 = vtanh.f32 %v1215_v43  ;;  %v4998_v43 = vld [vmem:[#allocation10 + $0x4] sm:$0xf]  ;;  %v4510_v10 = vld [vmem:[#allocation10 + $0x2fc] sm:$0xf0]  ;;  %v4454_v32 = vld [vmem:[#allocation10 + $0x28c] sm:$0xf0] }
 0x117   : > { %1650 = vmatmul.bf16.vlgmr.msra.gmra.mxu2 %v1224_v11 }
 0x118   : > { %2470 = vmatpush.bf16.msra.mxu2 %v4337_v45  ;;  %v4473_v45 = vor.u32 %v5085_v42, %v4472_v40  ;;  %2451 = vmatpush.bf16.msra.mxu0 %v4137_v41  ;;  %v4565_v42 = vor.u32 %v5107_v39, %v4564_v38  ;;  %v4426_v38 = vld [vmem:[#allocation10 + $0x254] sm:$0xf0] }
 0x119   : > { %v1203_v46 = vpop.f32.mrf.mxu2 }
 0x11a   : > { %v1216_v47 = vpop.f32.mrf.mxu3  ;;  %v5082_v46 = vld [vmem:[#allocation10 + $0x2a4] sm:$0xf]  ;;  %2460 = vmatpush.bf16.msra.mxu1 %v4473_v45  ;;  %v5104_v45 = vld [vmem:[#allocation10 + $0x354] sm:$0xf] }
 0x11b   : > { %v4474_v47 = vld [vmem:[#allocation10 + $0x2bc] sm:$0xf0] }
 0x11c   : > { %v5331_v48 = vpop.eup %5330  ;;  %2471 = vmatpush.bf16.msra.mxu2 %v4309_v54  ;;  %v4342_v54 = vld [vmem:[#allocation10 + $0x1ac] sm:$0xf0] }
 0x11d   : > { %v1225_v50 = vpack.c.bf16 %v5331_v48, %v5331_v48  ;;  %v4340_v48 = vld [vmem:[#allocation10 + $0x190] sm:$0xf]  ;;  %v4345_v56 = vor.u32 %v5048_v52, %v4342_v54  ;;  %v5100_v54 = vld [vmem:[#allocation10 + $0x330] sm:$0xf0] }
 0x11e   : > { %v4341_v55 = vor.u32 %v5051_v51, %v4340_v48  ;;  %v4200_v48 = vld [vmem:[#allocation10 + $0x78] sm:$0xf] }
 0x11f   : > { %1663 = vmatmul.bf16.vlgmr.msra.gmra.mxu3 %v1225_v50  ;;  %v4536_v51 = vld [vmem:[#allocation10 + $0x318] sm:$0xf] }
 0x120   : > { %2472 = vmatpush.bf16.msra.mxu2 %v4281_v60  ;;  %2483 = vmatpush.bf16.msra.mxu3 %v4561_v15  ;;  %v4445_v60 = vor.u32 %v5078_v58, %v4444_v57  ;;  %v5034_v15 = vld [vmem:[#allocation10 + $0x124] sm:$0xf]  ;;  %v4537_v57 = vor.u32 %v5100_v54, %v4536_v51  ;;  %v5055_v54 = vld [vmem:[#allocation10 + $0x1cc] sm:$0xf] }
 0x121   : > { %2496 = vmatpush.bf16.msrb.mxu0 %v4341_v55  ;;  %v4289_v18 = vor.u32 %v5034_v15, %v4286_v16  ;;  %v5013_v55 = vld [vmem:[#allocation10 + $0x7c] sm:$0xf]  ;;  %v5002_v15 = vld [vmem:[#allocation10 + $0x20] sm:$0xf0]  ;;  %v4480_v16 = vld [vmem:[#allocation10 + $0x2a8] sm:$0xf] }
 0x122   : > { %2461 = vmatpush.bf16.msra.mxu1 %v4445_v60  ;;  %v4538_v60 = vld [vmem:[#allocation10 + $0x334] sm:$0xf0]  ;;  %v5058_v51 = vld [vmem:[#allocation10 + $0x1e0] sm:$0xf0] }
 0x123   : > { %v4541_v61 = vor.u32 %v5097_v59, %v4538_v60 }
 0x124   : > { %2473 = vmatpush.bf16.msra.mxu2 %v4253_v2  ;;  %2484 = vmatpush.bf16.msra.mxu3 %v4533_v27  ;;  %v5041_v2 = vld [vmem:[#allocation10 + $0x15c] sm:$0xf]  ;;  %v5027_v27 = vld [vmem:[#allocation10 + $0xec] sm:$0xf] }
 0x125   : > { %v4317_v4 = vor.u32 %v5041_v2, %v4314_v3  ;;  %2497 = vmatpush.bf16.msrb.mxu0 %v4313_v1  ;;  %v4261_v30 = vor.u32 %v5027_v27, %v4258_v28  ;;  %v4508_v1 = vld [vmem:[#allocation10 + $0x2e0] sm:$0xf]  ;;  %v4452_v27 = vld [vmem:[#allocation10 + $0x270] sm:$0xf]  ;;  %v5079_v28 = vld [vmem:[#allocation10 + $0x288] sm:$0xf0] }
 0x126   : > { %2462 = vmatpush.bf16.msra.mxu1 %v4417_v7 }
 0x127   : > { %1702 = vmatmul.bf16.vlgmr.msrb.gmra.mxu2 %v1224_v11  ;;  %v4141_v11 = vor.u32 %v4998_v43, %v4138_v44  ;;  %v5020_v43 = vld [vmem:[#allocation10 + $0xb4] sm:$0xf]  ;;  %v4230_v44 = vld [vmem:[#allocation10 + $0xcc] sm:$0xf0] }
 0x128   : > { %2474 = vmatpush.bf16.msra.mxu2 %v4225_v12  ;;  %2485 = vmatpush.bf16.msra.mxu3 %v4505_v37  ;;  %v4365_v37 = vor.u32 %v5054_v33, %v4362_v49  ;;  %v4457_v33 = vor.u32 %v5076_v31, %v4454_v32  ;;  %v5072_v49 = vld [vmem:[#allocation10 + $0x250] sm:$0xf0] }
 0x129   : > { %2498 = vmatpush.bf16.msrb.mxu0 %v4285_v17  ;;  %v4145_v17 = vor.u32 %v5002_v15, %v4144_v14 }
 0x12a   : > { %2463 = vmatpush.bf16.msra.mxu1 %v4389_v21 }
 0x12c   : > { %2475 = vmatpush.bf16.msra.mxu2 %v4197_v26  ;;  %v5030_v26 = vld [vmem:[#allocation10 + $0x100] sm:$0xf0] }
 0x12d   : > { %v4257_v29 = vor.u32 %v5030_v26, %v4256_v24  ;;  %v4482_v24 = vld [vmem:[#allocation10 + $0x2c4] sm:$0xf0] }
 0x12e   : > { %2464 = vmatpush.bf16.msra.mxu1 %v4361_v34  ;;  %v4424_v34 = vld [vmem:[#allocation10 + $0x238] sm:$0xf] }
 0x12f   : > { %1715 = vmatmul.bf16.vlgmr.msrb.gmra.mxu3 %v1225_v50  ;;  %v4477_v50 = vor.u32 %v5082_v46, %v4474_v47  ;;  %2499 = vmatpush.bf16.msrb.mxu0 %v4257_v29  ;;  %v4566_v46 = vld [vmem:[#allocation10 + $0x36c] sm:$0xf0] }
 0x130   : > { %2476 = vmatpush.bf16.msra.mxu2 %v4169_v35  ;;  %v4228_v35 = vld [vmem:[#allocation10 + $0xb0] sm:$0xf]  ;;  %v4569_v47 = vor.u32 %v5104_v45, %v4566_v46  ;;  %v5062_v45 = vld [vmem:[#allocation10 + $0x204] sm:$0xf] }
 0x131   : > { %2486 = vmatpush.bf16.msra.mxu3 %v4477_v50  ;;  %v4229_v41 = vor.u32 %v5023_v36, %v4228_v35  ;;  %v5016_v50 = vld [vmem:[#allocation10 + $0x90] sm:$0xf0]  ;;  %v1290_v35 = vld [vmem:[#allocation8] sm:$0x3]  ;;  %v4425_v36 = vor.u32 %v5072_v49, %v4424_v34  ;;  %v4572_v49 = vld [vmem:[#allocation10 + $0x358] sm:$0xf] }
 0x132   : > { %2509 = vmatpush.bf16.msrb.mxu1 %v4565_v42  ;;  %v4201_v52 = vor.u32 %v5016_v50, %v4200_v48  ;;  %v4396_v42 = vld [vmem:[#allocation10 + $0x200] sm:$0xf]  ;;  %v4368_v50 = vld [vmem:[#allocation10 + $0x1c8] sm:$0xf]  ;;  %v5024_v34 = vld [vmem:[#allocation10 + $0xd0] sm:$0xf0] }
 0x133   : > { %2500 = vmatpush.bf16.msrb.mxu0 %v4229_v41 }
 0x134   : > { %2477 = vmatpush.bf16.msra.mxu2 %v4141_v11  ;;  %v4233_v11 = vor.u32 %v5020_v43, %v4230_v44  ;;  %v5065_v43 = vld [vmem:[#allocation10 + $0x218] sm:$0xf0] }
 0x135   : > { %2487 = vmatpush.bf16.msra.mxu3 %v4449_v0  ;;  %v5009_v0 = vld [vmem:[#allocation10 + $0x58] sm:$0xf0]  ;;  %v4397_v44 = vor.u32 %v5065_v43, %v4396_v42 }
 0x136   : > { %2510 = vmatpush.bf16.msrb.mxu1 %v4537_v57  ;;  %v4173_v3 = vor.u32 %v5009_v0, %v4172_v63  ;;  %v5049_v63 = vld [vmem:[#allocation10 + $0x19c] sm:$0xf]  ;;  %v4350_v0 = vld [vmem:[#allocation10 + $0x1b4] sm:$0xf0] }
 0x137   : > { %2501 = vmatpush.bf16.msrb.mxu0 %v4201_v52  ;;  %v4369_v52 = vor.u32 %v5058_v51, %v4368_v50  ;;  %v5101_v50 = vld [vmem:[#allocation10 + $0x338] sm:$0xf0]  ;;  %v5014_v51 = vld [vmem:[#allocation10 + $0x84] sm:$0xf] }
 0x138   : > { %2522 = vmatpush.bf16.msrb.mxu2 %v4345_v56  ;;  %v4202_v56 = vld [vmem:[#allocation10 + $0x94] sm:$0xf0] }
 0x139   : > { %2488 = vmatpush.bf16.msra.mxu3 %v4421_v13  ;;  %v4205_v58 = vor.u32 %v5013_v55, %v4202_v56  ;;  %v4513_v13 = vor.u32 %v5090_v9, %v4510_v10  ;;  %v4370_v55 = vld [vmem:[#allocation10 + $0x1e4] sm:$0xf0]  ;;  %v5042_v10 = vld [vmem:[#allocation10 + $0x164] sm:$0xf] }
 0x13a   : > { %v4373_v56 = vor.u32 %v5055_v54, %v4370_v55  ;;  %v5098_v54 = vld [vmem:[#allocation10 + $0x324] sm:$0xf]  ;;  %v4546_v55 = vld [vmem:[#allocation10 + $0x33c] sm:$0xf0] }
 0x13b   : > { %2502 = vmatpush.bf16.msrb.mxu0 %v4173_v3 }
 0x13c   : > { %2523 = vmatpush.bf16.msrb.mxu2 %v4317_v4  ;;  %v5093_v4 = vld [vmem:[#allocation10 + $0x2f8] sm:$0xf0] }
 0x13d   : > { %2489 = vmatpush.bf16.msra.mxu3 %v4393_v25  ;;  %v4509_v7 = vor.u32 %v5093_v4, %v4508_v1  ;;  %v4485_v25 = vor.u32 %v5083_v23, %v4482_v24  ;;  %v1293_v1 = vperm.slane %v1290_v35, 1 }
 0x13f   : > { %2511 = vmatpush.bf16.msrb.mxu1 %v4509_v7  ;;  %2503 = vmatpush.bf16.msrb.mxu0 %v4145_v17  ;;  %v4353_v7 = vor.u32 %v5049_v63, %v4350_v0  ;;  %v5007_v63 = vld [vmem:[#allocation10 + $0x4c] sm:$0xf]  ;;  %v4182_v0 = vld [vmem:[#allocation10 + $0x64] sm:$0xf0] }
 0x140   : > { %2524 = vmatpush.bf16.msrb.mxu2 %v4289_v18  ;;  %v5086_v18 = vld [vmem:[#allocation10 + $0x2c0] sm:$0xf0] }
 0x141   : > { %2490 = vmatpush.bf16.msra.mxu3 %v4365_v37  ;;  %v4481_v21 = vor.u32 %v5086_v18, %v4480_v16  ;;  %v5069_v37 = vld [vmem:[#allocation10 + $0x23c] sm:$0xf]  ;;  %v4292_v18 = vld [vmem:[#allocation10 + $0x128] sm:$0xf] }
 0x142   : > { %v4429_v39 = vor.u32 %v5069_v37, %v4426_v38  ;;  %v4238_v38 = vld [vmem:[#allocation10 + $0xd4] sm:$0xf0] }
 0x143   : > { %2512 = vmatpush.bf16.msrb.mxu1 %v4481_v21  ;;  %v4294_v21 = vld [vmem:[#allocation10 + $0x144] sm:$0xf0] }
 0x144   : > { %2525 = vmatpush.bf16.msrb.mxu2 %v4261_v30  ;;  %v4453_v30 = vor.u32 %v5079_v28, %v4452_v27  ;;  %v4297_v27 = vor.u32 %v5035_v20, %v4294_v21  ;;  %v4264_v28 = vld [vmem:[#allocation10 + $0xf0] sm:$0xf] }
 0x145   : > { %2535 = vmatpush.bf16.msrb.mxu3 %v4569_v47 }
 0x147   : > { %2513 = vmatpush.bf16.msrb.mxu1 %v4453_v30  ;;  %v5028_v30 = vld [vmem:[#allocation10 + $0xf4] sm:$0xf] }
 0x148   : > { %2526 = vmatpush.bf16.msrb.mxu2 %v4233_v11  ;;  %v4398_v11 = vld [vmem:[#allocation10 + $0x21c] sm:$0xf0] }
 0x149   : > { %2536 = vmatpush.bf16.msrb.mxu3 %v4541_v61  ;;  %v4401_v46 = vor.u32 %v5062_v45, %v4398_v11  ;;  %v4208_v45 = vld [vmem:[#allocation10 + $0x80] sm:$0xf]  ;;  %v5017_v11 = vld [vmem:[#allocation10 + $0x98] sm:$0xf0] }
 0x14b   : > { %2514 = vmatpush.bf16.msrb.mxu1 %v4425_v36  ;;  %v5021_v36 = vld [vmem:[#allocation10 + $0xbc] sm:$0xf] }
 0x14c   : > { %2527 = vmatpush.bf16.msrb.mxu2 %v4205_v58 }
 0x14d   : > { %2537 = vmatpush.bf16.msrb.mxu3 %v4513_v13  ;;  %v4322_v13 = vld [vmem:[#allocation10 + $0x17c] sm:$0xf0] }
 0x14e   : > { %v4325_v17 = vor.u32 %v5042_v10, %v4322_v13  ;;  %v4488_v10 = vld [vmem:[#allocation10 + $0x2b0] sm:$0xf]  ;;  %v5087_v13 = vld [vmem:[#allocation10 + $0x2c8] sm:$0xf0] }
 0x14f   : > { %2515 = vmatpush.bf16.msrb.mxu1 %v4397_v44  ;;  %v4489_v21 = vor.u32 %v5087_v13, %v4488_v10  ;;  %v5116_v10 = vld [vmem:[%s6271_s7 + $0x30] sm:$0xff] }
 0x150   : > { %2528 = vmatpush.bf16.msrb.mxu2 %v4177_v8  ;;  %v4320_v8 = vld [vmem:[#allocation10 + $0x160] sm:$0xf]  ;;  %v4188_v13 = vld [vmem:[#allocation10 + $0x50] sm:$0xf] }
 0x151   : > { %2538 = vmatpush.bf16.msrb.mxu3 %v4485_v25  ;;  %v4293_v25 = vor.u32 %v5038_v19, %v4292_v18  ;;  %v4356_v18 = vld [vmem:[#allocation10 + $0x1a0] sm:$0xf]  ;;  %v5053_v19 = vld [vmem:[#allocation10 + $0x1b8] sm:$0xf0] }
 0x153   : > { %2516 = vmatpush.bf16.msrb.mxu1 %v4369_v52  ;;  %v4210_v52 = vld [vmem:[#allocation10 + $0x9c] sm:$0xf0] }
 0x154   : > { %2529 = vmatpush.bf16.msrb.mxu2 %v4149_v22 }
 0x155   : > { %2539 = vmatpush.bf16.msrb.mxu3 %v4457_v33  ;;  %v4236_v33 = vld [vmem:[#allocation10 + $0xb8] sm:$0xf] }
 0x156   : > { %v4237_v43 = vor.u32 %v5024_v34, %v4236_v33  ;;  %v5073_v33 = vld [vmem:[#allocation10 + $0x258] sm:$0xf0] }
 0x159   : > { %2540 = vmatpush.bf16.msrb.mxu3 %v4429_v39  ;;  %v5105_v39 = vld [vmem:[#allocation10 + $0x35c] sm:$0xf] }
 0x15d   : > { %2541 = vmatpush.bf16.msrb.mxu3 %v4401_v46  ;;  %v4241_v46 = vor.u32 %v5021_v36, %v4238_v38  ;;  %v4300_v36 = vld [vmem:[#allocation10 + $0x130] sm:$0xf] }
 0x161   : > { %2542 = vmatpush.bf16.msrb.mxu3 %v4373_v56  ;;  %v4209_v56 = vor.u32 %v5017_v11, %v4208_v45  ;;  %v4406_v45 = vld [vmem:[#allocation10 + $0x224] sm:$0xf0]  ;;  %v4272_v11 = vld [vmem:[#allocation10 + $0xf8] sm:$0xf] }
 0x174   : > { %v5982_v12 = vpop.f32.mrf.mxu0 }
 0x17c   : > { %v5984_v53 = vpop.f32.mrf.mxu1  ;;  %v1627_v40 = vpop.f32.mrf.mxu0 }
 0x17d   : > { %v1292_v40 = vperm.slane %v1290_v35, 0  ;;  %v5108_v35 = vld [vmem:[#allocation10 + $0x370] sm:$0xf0] }
 0x17e   : > { %v4573_v44 = vor.u32 %v5108_v35, %v4572_v49  ;;  %v5070_v49 = vld [vmem:[#allocation10 + $0x244] sm:$0xf]  ;;  %v4434_v35 = vld [vmem:[#allocation10 + $0x25c] sm:$0xf0] }
 0x17f   : > { %v1626_v47 = vadd.f32 %v5982_v12, %v1292_v40  ;;  %v5052_v12 = vld [vmem:[#allocation10 + $0x1b0] sm:$0xf0]  ;;  %v4574_v40 = vld [vmem:[#allocation10 + $0x374] sm:$0xf0] }
 0x181   : > { %v1639_v57 = vadd.f32 %v5984_v53, %v1626_v47  ;;  %v5045_v53 = vld [vmem:[#allocation10 + $0x178] sm:$0xf0]  ;;  %v4577_v47 = vor.u32 %v5105_v39, %v4574_v40  ;;  %v4437_v39 = vor.u32 %v5070_v49, %v4434_v35  ;;  %v4404_v40 = vld [vmem:[#allocation10 + $0x208] sm:$0xf] }
 0x182   : > { %v4321_v16 = vor.u32 %v5045_v53, %v4320_v8  ;;  %v4185_v8 = vor.u32 %v5007_v63, %v4182_v0  ;;  %v4552_v63 = vld [vmem:[#allocation10 + $0x328] sm:$0xf]  ;;  %v5102_v0 = vld [vmem:[#allocation10 + $0x340] sm:$0xf0] }
 0x183   : > { %v5123_v35 = vld [vmem:[%s6271_s7 + $0x68] sm:$0xff] }
 0x184   : > { %v1640_v62 = vpop.f32.mrf.mxu1  ;;  %v5986_v2 = vpop.f32.mrf.mxu0 }
 0x185   : > { %v4348_v62 = vld [vmem:[#allocation10 + $0x198] sm:$0xf]  ;;  %v1678_v14 = vadd.f32 %v5986_v2, %v1293_v1  ;;  %v5091_v1 = vld [vmem:[#allocation10 + $0x2ec] sm:$0xf] }
 0x186   : > { %v4349_v6 = vor.u32 %v5052_v12, %v4348_v62  ;;  %v4516_v62 = vld [vmem:[#allocation10 + $0x2e8] sm:$0xf]  ;;  %v5094_v12 = vld [vmem:[#allocation10 + $0x300] sm:$0xf0] }
 0x18c   : > { %v5988_v26 = vpop.f32.mrf.mxu1  ;;  %v1679_v29 = vpop.f32.mrf.mxu0 }
 0x18d   : > { %v1691_v15 = vadd.f32 %v5988_v26, %v1678_v14  ;;  %v5031_v29 = vld [vmem:[#allocation10 + $0x108] sm:$0xf0]  ;;  %v4266_v26 = vld [vmem:[#allocation10 + $0x10c] sm:$0xf0]  ;;  %v5000_v14 = vld [vmem:[#allocation10 + $0x14] sm:$0xf] }
 0x18e   : > { %v4265_v31 = vor.u32 %v5031_v29, %v4264_v28  ;;  %v4269_v32 = vor.u32 %v5028_v30, %v4266_v26  ;;  %v4462_v28 = vld [vmem:[#allocation10 + $0x294] sm:$0xf0]  ;;  %v4328_v29 = vld [vmem:[#allocation10 + $0x168] sm:$0xf]  ;;  %v5046_v30 = vld [vmem:[#allocation10 + $0x180] sm:$0xf0] }
 0x18f   : > { %v4329_v34 = vor.u32 %v5046_v30, %v4328_v29  ;;  %v5074_v29 = vld [vmem:[#allocation10 + $0x260] sm:$0xf0] }
 0x194   : > { %v1692_v41 = vpop.f32.mrf.mxu1 }
 0x19a   : > { %v1651_v48 = vpop.f32.mrf.mxu2 }
 0x19b   : > { %v1652_v58 = vadd.f32 %v1651_v48, %v1639_v57  ;;  %v4544_v48 = vld [vmem:[#allocation10 + $0x320] sm:$0xf] }
 0x19c   : > { %v4545_v57 = vor.u32 %v5101_v50, %v4544_v48  ;;  %v4376_v50 = vld [vmem:[#allocation10 + $0x1d0] sm:$0xf] }
 0x1a2   : > { %v1664_v59 = vpop.f32.mrf.mxu3  ;;  %v1653_v61 = vpop.f32.mrf.mxu2 }
 0x1a3   : > { %v1665_v60 = vadd.f32 %v1664_v59, %v1652_v58  ;;  %v4180_v58 = vld [vmem:[#allocation10 + $0x48] sm:$0xf]  ;;  %v5010_v59 = vld [vmem:[#allocation10 + $0x60] sm:$0xf0]  ;;  %v4549_v61 = vor.u32 %v5098_v54, %v4546_v55  ;;  %v4378_v55 = vld [vmem:[#allocation10 + $0x1ec] sm:$0xf0] }
 0x1a5   : > { %5332 = vtanh.f32 %v1665_v60  ;;  %v4213_v60 = vor.u32 %v5014_v51, %v4210_v52  ;;  %v5059_v51 = vld [vmem:[#allocation10 + $0x1e8] sm:$0xf0]  ;;  %v5056_v52 = vld [vmem:[#allocation10 + $0x1d4] sm:$0xf] }
 0x1aa   : > { %v1666_v3 = vpop.f32.mrf.mxu3  ;;  %v1703_v5 = vpop.f32.mrf.mxu2 }
 0x1ab   : > { %v5333_v4 = vpop.eup %5332  ;;  %v1704_v22 = vadd.f32 %v1703_v5, %v1691_v15  ;;  %v4518_v3 = vld [vmem:[#allocation10 + $0x304] sm:$0xf0]  ;;  %v4517_v5 = vor.u32 %v5094_v12, %v4516_v62  ;;  %v4154_v15 = vld [vmem:[#allocation10 + $0x2c] sm:$0xf0] }
 0x1ac   : > { %v5992_v9 = vpack.c.bf16 %v5333_v4, %v5333_v4  ;;  %v4181_v4 = vor.u32 %v5010_v59, %v4180_v58  ;;  %v4521_v53 = vor.u32 %v5091_v1, %v4518_v3  ;;  %v4244_v58 = vld [vmem:[#allocation10 + $0xc0] sm:$0xf]  ;;  %v5025_v59 = vld [vmem:[#allocation10 + $0xd8] sm:$0xf0]  ;;  %v4216_v1 = vld [vmem:[#allocation10 + $0x88] sm:$0xf] }
 0x1ad   : > { %v4245_v12 = vor.u32 %v5025_v59, %v4244_v58  ;;  %v5018_v3 = vld [vmem:[#allocation10 + $0xa0] sm:$0xf0]  ;;  %v5149_v58 = vld [vmem:[%s6275_s11 + $0x38] sm:$0xff] }
 0x1ae   : > { %2452 = vmatmul.bf16.vlgmr.msra.gmra.mxu0 %v5992_v9  ;;  %2478 = vmatmul.bf16.vlgmr.msra.gmra.mxu2 %v5992_v9  ;;  %v5137_v59 = vld [vmem:[%s6273_s9 + $0x58] sm:$0xff] }
 0x1af   : > { %2548 = vmatpush.bf16.msra.mxu0 %v4349_v6  ;;  %2574 = vmatpush.bf16.msra.mxu2 %v4353_v7  ;;  %v4152_v6 = vld [vmem:[#allocation10 + $0x10] sm:$0xf]  ;;  %v5003_v7 = vld [vmem:[#allocation10 + $0x28] sm:$0xf0] }
 0x1b0   : > { %v4153_v20 = vor.u32 %v5003_v7, %v4152_v6  ;;  %v4553_v6 = vor.u32 %v5102_v0, %v4552_v63  ;;  %v4217_v7 = vor.u32 %v5018_v3, %v4216_v1  ;;  %v5136_v63 = vld [vmem:[%s6273_s9 + $0x50] sm:$0xff]  ;;  %v5154_v0 = vld [vmem:[%s6275_s11 + $0x60] sm:$0xff]  ;;  %v5147_v3 = vld [vmem:[%s6275_s11 + $0x28] sm:$0xff] }
 0x1b1   : > { %v5126_v1 = vld [vmem:[%s6273_s9] sm:$0xff] }
 0x1b2   : > { %v1716_v23 = vpop.f32.mrf.mxu3  ;;  %v1705_v2 = vpop.f32.mrf.mxu2 }
 0x1b3   : > { %v1717_v24 = vadd.f32 %v1716_v23, %v1704_v22  ;;  %2549 = vmatpush.bf16.msra.mxu0 %v4321_v16  ;;  %2575 = vmatpush.bf16.msra.mxu2 %v4325_v17  ;;  %v5084_v16 = vld [vmem:[#allocation10 + $0x2b4] sm:$0xf]  ;;  %v4490_v17 = vld [vmem:[#allocation10 + $0x2cc] sm:$0xf0]  ;;  %v4157_v22 = vor.u32 %v5000_v14, %v4154_v15  ;;  %v5011_v14 = vld [vmem:[#allocation10 + $0x68] sm:$0xf0] }
 0x1b4   : > { %v4493_v23 = vor.u32 %v5084_v16, %v4490_v17  ;;  %v5080_v2 = vld [vmem:[#allocation10 + $0x290] sm:$0xf0]  ;;  %v5124_v15 = vld [vmem:[%s6271_s7 + $0x70] sm:$0xff]  ;;  %v4189_v17 = vor.u32 %v5011_v14, %v4188_v13  ;;  %v5134_v13 = vld [vmem:[%s6273_s9 + $0x40] sm:$0xff] }
 0x1b5   : > { %5334 = vtanh.f32 %v1717_v24  ;;  %v4460_v24 = vld [vmem:[#allocation10 + $0x278] sm:$0xf]  ;;  %v5152_v14 = vld [vmem:[%s6275_s11 + $0x50] sm:$0xff] }
 0x1b6   : > { %v4461_v26 = vor.u32 %v5080_v2, %v4460_v24  ;;  %v4468_v2 = vld [vmem:[#allocation10 + $0x280] sm:$0xf] }
 0x1b7   : > { %2550 = vmatpush.bf16.msra.mxu0 %v4293_v25  ;;  %2576 = vmatpush.bf16.msra.mxu2 %v4297_v27  ;;  %v4357_v25 = vor.u32 %v5053_v19, %v4356_v18  ;;  %v5077_v27 = vld [vmem:[#allocation10 + $0x27c] sm:$0xf]  ;;  %v4496_v18 = vld [vmem:[#allocation10 + $0x2b8] sm:$0xf]  ;;  %v5088_v19 = vld [vmem:[#allocation10 + $0x2d0] sm:$0xf0] }
 0x1ba   : > { %v1718_v37 = vpop.f32.mrf.mxu3 }
 0x1bb   : > { %v5335_v41 = vpop.eup %5334  ;;  %2551 = vmatpush.bf16.msra.mxu0 %v4265_v31  ;;  %2577 = vmatpush.bf16.msra.mxu2 %v4269_v32  ;;  %v4465_v31 = vor.u32 %v5077_v27, %v4462_v28  ;;  %v4432_v32 = vld [vmem:[#allocation10 + $0x240] sm:$0xf]  ;;  %v5039_v37 = vld [vmem:[#allocation10 + $0x148] sm:$0xf0]  ;;  %v4440_v28 = vld [vmem:[#allocation10 + $0x248] sm:$0xf] }
 0x1bc   : > { %v5998_v42 = vpack.c.bf16 %v5335_v41, %v5335_v41  ;;  %v4433_v38 = vor.u32 %v5073_v33, %v4432_v32  ;;  %v5066_v41 = vld [vmem:[#allocation10 + $0x220] sm:$0xf0]  ;;  %v4441_v30 = vor.u32 %v5074_v29, %v4440_v28  ;;  %v4384_v33 = vld [vmem:[#allocation10 + $0x1d8] sm:$0xf] }
 0x1bd   : > { %v5143_v28 = vld [vmem:[%s6275_s11 + $0x8] sm:$0xff] }
 0x1be   : > { %2465 = vmatmul.bf16.vlgmr.msra.gmra.mxu1 %v5998_v42  ;;  %2491 = vmatmul.bf16.vlgmr.msra.gmra.mxu3 %v5998_v42 }
 0x1bf   : > { %2504 = vmatmul.bf16.vlgmr.msrb.gmra.mxu0 %v5992_v9  ;;  %2530 = vmatmul.bf16.vlgmr.msrb.gmra.mxu2 %v5992_v9 }
 0x1c0   : > { %2552 = vmatpush.bf16.msra.mxu0 %v4237_v43  ;;  %2561 = vmatpush.bf16.msra.mxu1 %v4573_v44  ;;  %v4301_v43 = vor.u32 %v5039_v37, %v4300_v36  ;;  %v5063_v44 = vld [vmem:[#allocation10 + $0x20c] sm:$0xf]  ;;  %v5122_v36 = vld [vmem:[%s6271_s7 + $0x60] sm:$0xff]  ;;  %v5113_v37 = vld [vmem:[%s6271_s7 + $0x18] sm:$0xff] }
 0x1c1   : > { %2578 = vmatpush.bf16.msra.mxu2 %v4241_v46  ;;  %2587 = vmatpush.bf16.msra.mxu3 %v4577_v47  ;;  %v5032_v46 = vld [vmem:[#allocation10 + $0x110] sm:$0xf0]  ;;  %v4405_v47 = vor.u32 %v5066_v41, %v4404_v40  ;;  %v4409_v48 = vor.u32 %v5063_v44, %v4406_v45  ;;  %v5132_v40 = vld [vmem:[%s6273_s9 + $0x30] sm:$0xff]  ;;  %v5131_v45 = vld [vmem:[%s6273_s9 + $0x28] sm:$0xff] }
 0x1c2   : > { %v4273_v54 = vor.u32 %v5032_v46, %v4272_v11  ;;  %v5120_v41 = vld [vmem:[%s6271_s7 + $0x50] sm:$0xff]  ;;  %v5141_v44 = vld [vmem:[%s6273_s9 + $0x78] sm:$0xff]  ;;  %v5119_v11 = vld [vmem:[%s6271_s7 + $0x48] sm:$0xff] }
 0x1c3   : > { %v5110_v46 = vld [vmem:[%s6271_s7] sm:$0xff] }
 0x1c4   : > { %2553 = vmatpush.bf16.msra.mxu0 %v4209_v56  ;;  %2562 = vmatpush.bf16.msra.mxu1 %v4545_v57  ;;  %v4580_v56 = vld [vmem:[#allocation10 + $0x360] sm:$0xf]  ;;  %v5109_v57 = vld [vmem:[#allocation10 + $0x378] sm:$0xf0] }
 0x1c5   : > { %2579 = vmatpush.bf16.msra.mxu2 %v4213_v60  ;;  %2588 = vmatpush.bf16.msra.mxu3 %v4549_v61  ;;  %v4377_v60 = vor.u32 %v5059_v51, %v4376_v50  ;;  %v4381_v61 = vor.u32 %v5056_v52, %v4378_v55  ;;  %v4581_v62 = vor.u32 %v5109_v57, %v4580_v56  ;;  %v5118_v50 = vld [vmem:[%s6271_s7 + $0x40] sm:$0xff]  ;;  %v5139_v51 = vld [vmem:[%s6273_s9 + $0x68] sm:$0xff]  ;;  %v5157_v52 = vld [vmem:[%s6275_s11 + $0x78] sm:$0xff] }
 0x1c6   : > { %v5138_v55 = vld [vmem:[%s6273_s9 + $0x60] sm:$0xff]  ;;  %v5156_v56 = vld [vmem:[%s6275_s11 + $0x70] sm:$0xff] }
 0x1c7   : > { %v5128_v57 = vld [vmem:[%s6273_s9 + $0x10] sm:$0xff] }
 0x1c8   : > { %2554 = vmatpush.bf16.msra.mxu0 %v4181_v4  ;;  %2563 = vmatpush.bf16.msra.mxu1 %v4517_v5  ;;  %v5117_v4 = vld [vmem:[%s6271_s7 + $0x38] sm:$0xff] }
 0x1c9   : > { %2580 = vmatpush.bf16.msra.mxu2 %v4185_v8  ;;  %2589 = vmatpush.bf16.msra.mxu3 %v4521_v53  ;;  %v5125_v5 = vld [vmem:[%s6271_s7 + $0x78] sm:$0xff]  ;;  %v5095_v53 = vld [vmem:[#allocation10 + $0x308] sm:$0xf0] }
 0x1ca   : > { %v4524_v8 = vld [vmem:[#allocation10 + $0x2f0] sm:$0xf] }
 0x1cb   : > { %v4525_v16 = vor.u32 %v5095_v53, %v4524_v8  ;;  %v5146_v53 = vld [vmem:[%s6275_s11 + $0x20] sm:$0xff] }
 0x1cc   : > { %2555 = vmatpush.bf16.msra.mxu0 %v4153_v20  ;;  %2564 = vmatpush.bf16.msra.mxu1 %v4489_v21  ;;  %v5115_v20 = vld [vmem:[%s6271_s7 + $0x28] sm:$0xff]  ;;  %v4160_v21 = vld [vmem:[#allocation10 + $0x18] sm:$0xf] }
 0x1cd   : > { %2581 = vmatpush.bf16.msra.mxu2 %v4157_v22  ;;  %2590 = vmatpush.bf16.msra.mxu3 %v4493_v23  ;;  %v5004_v22 = vld [vmem:[#allocation10 + $0x30] sm:$0xf0]  ;;  %v4497_v23 = vor.u32 %v5088_v19, %v4496_v18  ;;  %v5151_v18 = vld [vmem:[%s6275_s11 + $0x48] sm:$0xff] }
 0x1ce   : > { %2517 = vmatmul.bf16.vlgmr.msrb.gmra.mxu1 %v5998_v42  ;;  %2543 = vmatmul.bf16.vlgmr.msrb.gmra.mxu3 %v5998_v42  ;;  %v4161_v24 = vor.u32 %v5004_v22, %v4160_v21 }
 0x1cf   : > { %2556 = vmatmul.bf16.vlgmr.msra.gmra.mxu0 %v5992_v9 }
 0x1d0   : > { %2600 = vmatpush.bf16.msrb.mxu0 %v4357_v25  ;;  %2565 = vmatpush.bf16.msra.mxu1 %v4461_v26  ;;  %v5081_v25 = vld [vmem:[#allocation10 + $0x298] sm:$0xf0]  ;;  %v4412_v26 = vld [vmem:[#allocation10 + $0x210] sm:$0xf] }
 0x1d1   : > { %2582 = vmatmul.bf16.vlgmr.msra.gmra.mxu2 %v5992_v9  ;;  %2591 = vmatpush.bf16.msra.mxu3 %v4465_v31  ;;  %v4469_v27 = vor.u32 %v5081_v25, %v4468_v2  ;;  %v5067_v31 = vld [vmem:[#allocation10 + $0x228] sm:$0xf0]  ;;  %v5150_v2 = vld [vmem:[%s6275_s11 + $0x40] sm:$0xff] }
 0x1d2   : > { %2764 = vmatpush.bf16.msrb.mxu2 %v5117_v4  ;;  %v4413_v32 = vor.u32 %v5067_v31, %v4412_v26  ;;  %v5179_v31 = vld [vmem:[%s6280_s16 + $0x38] sm:$0xff] }
 0x1d4   : > { %2601 = vmatpush.bf16.msrb.mxu0 %v4329_v34  ;;  %2566 = vmatpush.bf16.msra.mxu1 %v4433_v38  ;;  %v5060_v34 = vld [vmem:[#allocation10 + $0x1f0] sm:$0xf0] }
 0x1d5   : > { %2592 = vmatpush.bf16.msra.mxu3 %v4437_v39  ;;  %v4385_v49 = vor.u32 %v5060_v34, %v4384_v33  ;;  %v5121_v38 = vld [vmem:[%s6271_s7 + $0x58] sm:$0xff]  ;;  %v5112_v39 = vld [vmem:[%s6271_s7 + $0x10] sm:$0xff]  ;;  %v5142_v34 = vld [vmem:[%s6275_s11] sm:$0xff] }
 0x1d6   : > { %2765 = vmatpush.bf16.msrb.mxu2 %v5116_v10 }
 0x1d8   : > { %2602 = vmatpush.bf16.msrb.mxu0 %v4301_v43  ;;  %2567 = vmatpush.bf16.msra.mxu1 %v4405_v47  ;;  %v5111_v43 = vld [vmem:[%s6271_s7 + $0x8] sm:$0xff]  ;;  %v5140_v47 = vld [vmem:[%s6273_s9 + $0x70] sm:$0xff] }
 0x1d9   : > { %2593 = vmatpush.bf16.msra.mxu3 %v4409_v48  ;;  %v5130_v48 = vld [vmem:[%s6273_s9 + $0x20] sm:$0xff] }
 0x1da   : > { %2766 = vmatpush.bf16.msrb.mxu2 %v5115_v20 }
 0x1dc   : > { %2603 = vmatpush.bf16.msrb.mxu0 %v4273_v54  ;;  %2568 = vmatpush.bf16.msra.mxu1 %v4377_v60  ;;  %v5129_v54 = vld [vmem:[%s6273_s9 + $0x18] sm:$0xff]  ;;  %v5155_v60 = vld [vmem:[%s6275_s11 + $0x68] sm:$0xff] }
 0x1dd   : > { %2594 = vmatpush.bf16.msra.mxu3 %v4381_v61 }
 0x1df   : > { %2569 = vmatmul.bf16.vlgmr.msra.gmra.mxu1 %v5998_v42 }
 0x1e0   : > { %2613 = vmatpush.bf16.msrb.mxu1 %v4581_v62  ;;  %2604 = vmatpush.bf16.msrb.mxu0 %v4245_v12  ;;  %v5127_v62 = vld [vmem:[%s6273_s9 + $0x8] sm:$0xff]  ;;  %v5148_v12 = vld [vmem:[%s6275_s11 + $0x30] sm:$0xff] }
 0x1e1   : > { %2777 = vmatpush.bf16.msrb.mxu3 %v5125_v5  ;;  %v5135_v5 = vld [vmem:[%s6273_s9 + $0x48] sm:$0xff] }
 0x1e2   : > { %2595 = vmatmul.bf16.vlgmr.msra.gmra.mxu3 %v5998_v42 }
 0x1e4   : > { %2614 = vmatpush.bf16.msrb.mxu1 %v4553_v6  ;;  %2605 = vmatpush.bf16.msrb.mxu0 %v4217_v7  ;;  %v5153_v6 = vld [vmem:[%s6275_s11 + $0x58] sm:$0xff]  ;;  %v6129_v7 = vld [vmem:[#allocation11] sm:$0xff] }
 0x1e5   : > { %2778 = vmatpush.bf16.msrb.mxu3 %v5124_v15  ;;  %v1854_v10 = vperm.slane %v6129_v7, 0  ;;  %v1855_v20 = vperm.slane %v6129_v7, 1 }
 0x1e8   : > { %2615 = vmatpush.bf16.msrb.mxu1 %v4525_v16  ;;  %2606 = vmatpush.bf16.msrb.mxu0 %v4189_v17  ;;  %v5145_v16 = vld [vmem:[%s6275_s11 + $0x18] sm:$0xff] }
 0x1e9   : > { %2779 = vmatpush.bf16.msrb.mxu3 %v5123_v35  ;;  %v5178_v35 = vld [vmem:[%s6280_s16 + $0x30] sm:$0xff] }
 0x1ec   : > { %2616 = vmatpush.bf16.msrb.mxu1 %v4497_v23  ;;  %2607 = vmatpush.bf16.msrb.mxu0 %v4161_v24  ;;  %v5144_v23 = vld [vmem:[%s6275_s11 + $0x10] sm:$0xff] }
 0x1ed   : > { %2780 = vmatpush.bf16.msrb.mxu3 %v5122_v36 }
 0x1ef   : > { %2608 = vmatmul.bf16.vlgmr.msrb.gmra.mxu0 %v5992_v9  ;;  %v5114_v9 = vld [vmem:[%s6271_s7 + $0x20] sm:$0xff] }
 0x1f0   : > { %2617 = vmatpush.bf16.msrb.mxu1 %v4469_v27  ;;  %2767 = vmatpush.bf16.msrb.mxu2 %v5114_v9 }
 0x1f1   : > { %2781 = vmatpush.bf16.msrb.mxu3 %v5121_v38  ;;  %v5177_v38 = vld [vmem:[%s6280_s16 + $0x28] sm:$0xff] }
 0x1f4   : > { %2618 = vmatpush.bf16.msrb.mxu1 %v4441_v30  ;;  %2768 = vmatpush.bf16.msrb.mxu2 %v5113_v37 }
 0x1f5   : > { %2782 = vmatpush.bf16.msrb.mxu3 %v5120_v41  ;;  %v1857_v41 = vperm.slane %v6129_v7, 3 }
 0x1f8   : > { %2619 = vmatpush.bf16.msrb.mxu1 %v4413_v32  ;;  %2769 = vmatpush.bf16.msrb.mxu2 %v5112_v39 }
 0x1f9   : > { %2783 = vmatpush.bf16.msrb.mxu3 %v5119_v11 }
 0x1fc   : > { %2620 = vmatpush.bf16.msrb.mxu1 %v4385_v49  ;;  %2770 = vmatpush.bf16.msrb.mxu2 %v5111_v43  ;;  %v1856_v49 = vperm.slane %v6129_v7, 2 }
 0x1fd   : > { %2784 = vmatpush.bf16.msrb.mxu3 %v5118_v50 }
 0x1ff   : > { %2621 = vmatmul.bf16.vlgmr.msrb.gmra.mxu1 %v5998_v42  ;;  %v5133_v42 = vld [vmem:[%s6273_s9 + $0x38] sm:$0xff] }
 0x200   : > { %2943 = vmatpush.bf16.msra.mxu0 %v5133_v42  ;;  %2956 = vmatpush.bf16.msra.mxu1 %v5141_v44  ;;  %v5176_v44 = vld [vmem:[%s6280_s16 + $0x20] sm:$0xff] }
 0x201   : > { %2771 = vmatpush.bf16.msrb.mxu2 %v5110_v46  ;;  %3141 = vmatpush.bf16.msra.mxu3 %v5157_v52 }
 0x204   : > { %2944 = vmatpush.bf16.msra.mxu0 %v5132_v40  ;;  %2957 = vmatpush.bf16.msra.mxu1 %v5140_v47 }
 0x205   : > { %3142 = vmatpush.bf16.msra.mxu3 %v5156_v56  ;;  %3128 = vmatpush.bf16.msra.mxu2 %v5149_v58 }
 0x208   : > { %2945 = vmatpush.bf16.msra.mxu0 %v5131_v45  ;;  %2958 = vmatpush.bf16.msra.mxu1 %v5139_v51  ;;  %v5175_v51 = vld [vmem:[%s6280_s16 + $0x18] sm:$0xff] }
 0x209   : > { %3143 = vmatpush.bf16.msra.mxu3 %v5155_v60  ;;  %3129 = vmatpush.bf16.msra.mxu2 %v5148_v12 }
 0x20c   : > { %2946 = vmatpush.bf16.msra.mxu0 %v5130_v48  ;;  %2959 = vmatpush.bf16.msra.mxu1 %v5138_v55  ;;  %v1858_v55 = vperm.slane %v6129_v7, 4 }
 0x20d   : > { %3144 = vmatpush.bf16.msra.mxu3 %v5154_v0  ;;  %3130 = vmatpush.bf16.msra.mxu2 %v5147_v3  ;;  %v5172_v0 = vld [vmem:[%s6280_s16] sm:$0xff] }
 0x210   : > { %2947 = vmatpush.bf16.msra.mxu0 %v5129_v54  ;;  %2960 = vmatpush.bf16.msra.mxu1 %v5137_v59 }
 0x211   : > { %3145 = vmatpush.bf16.msra.mxu3 %v5153_v6  ;;  %3131 = vmatpush.bf16.msra.mxu2 %v5146_v53 }
 0x214   : > { %2948 = vmatpush.bf16.msra.mxu0 %v5128_v57  ;;  %2961 = vmatpush.bf16.msra.mxu1 %v5136_v63  ;;  %v5174_v57 = vld [vmem:[%s6280_s16 + $0x10] sm:$0xff]  ;;  %v1859_v63 = vperm.slane %v6129_v7, 5 }
 0x215   : > { %3146 = vmatpush.bf16.msra.mxu3 %v5152_v14  ;;  %3132 = vmatpush.bf16.msra.mxu2 %v5145_v16  ;;  %v1860_v16 = vperm.slane %v6129_v7, 6  ;;  %v5163_v7 = vld [vmem:[%s6277_s13 + $0x28] sm:$0xff] }
 0x218   : > { %2949 = vmatpush.bf16.msra.mxu0 %v5127_v62  ;;  %2962 = vmatpush.bf16.msra.mxu1 %v5135_v5 }
 0x219   : > { %3147 = vmatpush.bf16.msra.mxu3 %v5151_v18  ;;  %3133 = vmatpush.bf16.msra.mxu2 %v5144_v23  ;;  %v5164_v23 = vld [vmem:[%s6277_s13 + $0x30] sm:$0xff] }
 0x21c   : > { %2950 = vmatpush.bf16.msra.mxu0 %v5126_v1  ;;  %2963 = vmatpush.bf16.msra.mxu1 %v5134_v13 }
 0x21d   : > { %3148 = vmatpush.bf16.msra.mxu3 %v5150_v2  ;;  %3134 = vmatpush.bf16.msra.mxu2 %v5143_v28  ;;  %v5161_v2 = vld [vmem:[%s6277_s13 + $0x18] sm:$0xff] }
 0x221   : > { %3135 = vmatpush.bf16.msra.mxu2 %v5142_v34 }
 0x22b   : > { %v2453_v61 = vpop.f32.mrf.mxu0 }
 0x22c   : > { %v2454_v17 = vadd.f32 %v2453_v61, %v1854_v10  ;;  %v5173_v61 = vld [vmem:[%s6280_s16 + $0x8] sm:$0xff] }
 0x231   : > { %v2479_v4 = vpop.f32.mrf.mxu2 }
 0x232   : > { %v2480_v25 = vadd.f32 %v2479_v4, %v1855_v20 }
 0x233   : > { %v2455_v8 = vpop.f32.mrf.mxu0 }
 0x239   : > { %v2481_v15 = vpop.f32.mrf.mxu2 }
 0x23b   : > { %v2466_v19 = vpop.f32.mrf.mxu1 }
 0x23c   : > { %v2467_v21 = vadd.f32 %v2466_v19, %v2454_v17  ;;  %v2505_v22 = vpop.f32.mrf.mxu0 }
 0x23d   : > { %v2506_v36 = vadd.f32 %v2505_v22, %v1856_v49  ;;  %v5165_v22 = vld [vmem:[%s6277_s13 + $0x38] sm:$0xff] }
 0x23e   : > { %v2630_v24 = vpack.c.bf16 %v2467_v21, %v2467_v21  ;;  %3268 = vmatpush.bf16.msrb.mxu1 %v5165_v22  ;;  %v5171_v49 = vld [vmem:[#allocation14 + $0x8] sm:$0xff] }
 0x240   : > { %2772 = vmatmul.bf16.vlgmr.msrb.gmra.mxu2 %v2630_v24  ;;  %v5162_v24 = vld [vmem:[%s6277_s13 + $0x20] sm:$0xff] }
 0x241   : > { %v2492_v27 = vpop.f32.mrf.mxu3  ;;  %3308 = vmatpush.bf16.msrb.mxu2 %v5171_v49 }
 0x242   : > { %v2493_v29 = vadd.f32 %v2492_v27, %v2480_v25  ;;  %v2531_v30 = vpop.f32.mrf.mxu2  ;;  %3269 = vmatpush.bf16.msrb.mxu1 %v5164_v23  ;;  %v5160_v25 = vld [vmem:[%s6277_s13 + $0x10] sm:$0xff]  ;;  %v5159_v27 = vld [vmem:[%s6277_s13 + $0x8] sm:$0xff] }
 0x243   : > { %v2468_v26 = vpop.f32.mrf.mxu1  ;;  %v2532_v11 = vadd.f32 %v2531_v30, %v1857_v41  ;;  %v5158_v30 = vld [vmem:[%s6277_s13] sm:$0xff] }
 0x244   : > { %v2631_v32 = vpack.c.bf16 %v2493_v29, %v2493_v29  ;;  %v2507_v33 = vpop.f32.mrf.mxu0  ;;  %v5320_v29 = vld [vmem:[%s6272_s8] ss:$0 sm:$0xff] }
 0x246   : > { %2785 = vmatmul.bf16.vlgmr.msrb.gmra.mxu3 %v2631_v32  ;;  %3270 = vmatpush.bf16.msrb.mxu1 %v5163_v7 }
 0x247   : > { %3381 = vmatpush.bf16.msrb.mxu3 %v5179_v31 }
 0x249   : > { %v2494_v9 = vpop.f32.mrf.mxu3 }
 0x24a   : > { %v2533_v37 = vpop.f32.mrf.mxu2  ;;  %3271 = vmatpush.bf16.msrb.mxu1 %v5162_v24  ;;  %v5321_v9 = vld [vmem:[%s6274_s10] ss:$0 sm:$0xff] }
 0x24b   : > { %v2518_v42 = vpop.f32.mrf.mxu1  ;;  %3382 = vmatpush.bf16.msrb.mxu3 %v5178_v35  ;;  %v5170_v37 = vld [vmem:[#allocation14] sm:$0xff] }
 0x24c   : > { %v2519_v39 = vadd.f32 %v2518_v42, %v2506_v36  ;;  %v2557_v40 = vpop.f32.mrf.mxu0  ;;  %3309 = vmatpush.bf16.msrb.mxu2 %v5170_v37 }
 0x24d   : > { %v2558_v59 = vadd.f32 %v2557_v40, %v1858_v55 }
 0x24e   : > { %v2626_v43 = vmax.f32 %v2519_v39, 0.0  ;;  %3272 = vmatpush.bf16.msrb.mxu1 %v5161_v2 }
 0x24f   : > { %3383 = vmatpush.bf16.msrb.mxu3 %v5177_v38 }
 0x250   : > { %v2809_v45 = vpack.c.bf16 %v2626_v43, %v2626_v43 }
 0x251   : > { %v2544_v46 = vpop.f32.mrf.mxu3 }
 0x252   : > { %2951 = vmatmul.bf16.vlgmr.msra.gmra.mxu0 %v2809_v45  ;;  %v2545_v47 = vadd.f32 %v2544_v46, %v2532_v11  ;;  %3273 = vmatpush.bf16.msrb.mxu1 %v5160_v25 }
 0x253   : > { %v2520_v50 = vpop.f32.mrf.mxu1  ;;  %3384 = vmatpush.bf16.msrb.mxu3 %v5176_v44 }
 0x254   : > { %v2583_v48 = vpop.f32.mrf.mxu2  ;;  %v2559_v52 = vpop.f32.mrf.mxu0  ;;  %v2627_v54 = vmax.f32 %v2545_v47, 0.0 }
 0x255   : > { %v2584_v1 = vadd.f32 %v2583_v48, %v1859_v63 }
 0x256   : > { %v2810_v56 = vpack.c.bf16 %v2627_v54, %v2627_v54  ;;  %3274 = vmatpush.bf16.msrb.mxu1 %v5159_v27 }
 0x257   : > { %3385 = vmatpush.bf16.msrb.mxu3 %v5175_v51 }
 0x258   : > { %2964 = vmatmul.bf16.vlgmr.msra.gmra.mxu1 %v2810_v56 }
 0x259   : > { %v2546_v58 = vpop.f32.mrf.mxu3 }
 0x25a   : > { %3275 = vmatpush.bf16.msrb.mxu1 %v5158_v30 }
 0x25b   : > { %3386 = vmatpush.bf16.msrb.mxu3 %v5174_v57 }
 0x25c   : > { %v2585_v60 = vpop.f32.mrf.mxu2  ;;  %v2570_v62 = vpop.f32.mrf.mxu1 }
 0x25d   : > { %v2571_v12 = vadd.f32 %v2570_v62, %v2558_v59  ;;  %v5322_v59 = vld [vmem:[%s6276_s12] ss:$0 sm:$0xff] }
 0x25f   : > { %5336 = vtanh.f32 %v2571_v12  ;;  %3387 = vmatpush.bf16.msrb.mxu3 %v5173_v61 }
 0x263   : > { %3388 = vmatpush.bf16.msrb.mxu3 %v5172_v0 }
 0x264   : > { %v2572_v5 = vpop.f32.mrf.mxu1 }
 0x265   : > { %v2596_v3 = vpop.f32.mrf.mxu3  ;;  %v5337_v6 = vpop.eup %5336 }
 0x266   : > { %v2597_v4 = vadd.f32 %v2596_v3, %v2584_v1  ;;  %v2994_v8 = vpack.c.bf16 %v5337_v6, %v5337_v6 }
 0x268   : > { %5338 = vtanh.f32 %v2597_v4  ;;  %3136 = vmatmul.bf16.vlgmr.msra.gmra.mxu2 %v2994_v8 }
 0x26c   : > { %v2609_v53 = vpop.f32.mrf.mxu0 }
 0x26d   : > { %v2598_v10 = vpop.f32.mrf.mxu3  ;;  %v2610_v17 = vadd.f32 %v2609_v53, %v1860_v16 }
 0x26e   : > { %v5339_v13 = vpop.eup %5338 }
 0x26f   : > { %v2995_v14 = vpack.c.bf16 %v5339_v13, %v5339_v13 }
 0x271   : > { %3149 = vmatmul.bf16.vlgmr.msra.gmra.mxu3 %v2995_v14 }
 0x274   : > { %v2611_v15 = vpop.f32.mrf.mxu0 }
 0x27c   : > { %v2622_v18 = vpop.f32.mrf.mxu1 }
 0x27d   : > { %v2623_v19 = vadd.f32 %v2622_v18, %v2610_v17  ;;  %v5169_v17 = vld [vmem:[#allocation13 + $0x18] sm:$0xff]  ;;  %v5168_v18 = vld [vmem:[#allocation13 + $0x10] sm:$0xff] }
 0x27e   : > { %3211 = vmatpush.bf16.msrb.mxu0 %v5169_v17 }
 0x27f   : > { %v3316_v20 = vpack.c.bf16 %v2623_v19, %v2623_v19  ;;  %v5167_v19 = vld [vmem:[#allocation13 + $0x8] sm:$0xff] }
 0x281   : > { %3389 = vmatmul.bf16.vlgmr.msrb.gmra.mxu3 %v3316_v20  ;;  %v5166_v20 = vld [vmem:[#allocation13] sm:$0xff] }
 0x282   : > { %3212 = vmatpush.bf16.msrb.mxu0 %v5168_v18 }
 0x284   : > { %v2624_v21 = vpop.f32.mrf.mxu1 }
 0x286   : > { %3213 = vmatpush.bf16.msrb.mxu0 %v5167_v19 }
 0x28a   : > { %3214 = vmatpush.bf16.msrb.mxu0 %v5166_v20 }
 0x2c3   : > { %v2773_v28 = vpop.f32.mrf.mxu2 }
 0x2c4   : > { %v2774_v26 = vadd.f32 %v5320_v29, %v2773_v28 }
 0x2c9   : > { %v2786_v31 = vpop.f32.mrf.mxu3 }
 0x2ca   : > { %v2787_v32 = vadd.f32 %v2786_v31, %v2774_v26 }
 0x2cb   : > { %v2775_v33 = vpop.f32.mrf.mxu2 }
 0x2cc   : > { %v4646_v34 = vmul.f32 -1.442695, %v2787_v32  ;;  %v5723_v32 = vmov 128.0   ;;  %v5724_v33 = vmov 32.0  }
 0x2ce   : > { %5340 = vpow2.f32 %v4646_v34 }
 0x2cf   : > { %v2952_v35 = vpop.f32.mrf.mxu0 }
 0x2d0   : > { %v2953_v39 = vadd.f32 %v5321_v9, %v2952_v35 }
 0x2d1   : > { %v2788_v36 = vpop.f32.mrf.mxu3 }
 0x2d4   : > { %v5341_v42 = vpop.eup %5340 }
 0x2d5   : > { %v2793_v38 = vadd.f32 1.0, %v5341_v42  ;;  %v2965_v40 = vpop.f32.mrf.mxu1 }
 0x2d6   : > { %v2966_v41 = vadd.f32 %v2965_v40, %v2953_v39 }
 0x2d7   : > { %5342 = vrcp.f32 %v2793_v38  ;;  %v2954_v43 = vpop.f32.mrf.mxu0  ;;  %v2805_v48 = vand.u32 2147483648, %v2793_v38  ;;  %v2803_v51 = vand.u32 2147483647, %v2793_v38  ;;  %vm2799_vm2 = vweird.f32 %v2793_v38 }
 0x2d8   : > { %v2970_v44 = vsel %vm2969_vm0, %v2966_v41, -inf }
 0x2d9   : > { %2971 = vmax.xlane.f32.xlu0 %v2970_v44  ;;  %v2806_v54 = vor.u32 1.1754944e-38, %v2805_v48  ;;  %vm2804_vm4 = vcmp.eq.f32.partialorder %v2803_v51, 8.507059e+37  ;;  %v5323_v51 = vld [vmem:[#allocation16] ss:$0 sm:$0xff] }
 0x2dd   : > { %v5343_v45 = vpop.eup %5342  ;;  %v2967_v11 = vpop.f32.mrf.mxu1 }
 0x2de   : > { %v2795_v46 = vmul.f32 %v5343_v45, %v2793_v38  ;;  %vm2800_vm1 = vweird.f32 %v5343_v45 }
 0x2df   : > { %vm2801_vm3 = vmor %vm2799_vm2, %vm2800_vm1 }
 0x2e0   : > { %v2796_v47 = vsub.f32 1.0, %v2795_v46 }
 0x2e2   : > { %v2797_v50 = vmul.f32 %v5343_v45, %v2796_v47 }
 0x2e4   : > { %v2798_v52 = vadd.f32 %v5343_v45, %v2797_v50 }
 0x2e6   : > { %v2802_v55 = vsel %vm2801_vm3, %v5343_v45, %v2798_v52 }
 0x2e7   : > { %v2807_v56 = vsel %vm2804_vm4, %v2806_v54, %v2802_v55 }
 0x2e8   : > { %3400 = vadd.xlane.f32.xlu1 %v2807_v56  ;;  %v3154_v57 = vpack.c.bf16 %v2807_v56, %v2807_v56 }
 0x2ea   : > { %3276 = vmatmul.bf16.vlgmr.msrb.gmra.mxu1 %v3154_v57 }
 0x2eb   : > { %v3137_v58 = vpop.f32.mrf.mxu2 }
 0x2ec   : > { %v3138_v60 = vadd.f32 %v5322_v59, %v3137_v58 }
 0x2f3   : > { %v3139_v12 = vpop.f32.mrf.mxu2 }
 0x2f4   : > { %v3150_v61 = vpop.f32.mrf.mxu3 }
 0x2f5   : > { %v3151_v62 = vadd.f32 %v3150_v61, %v3138_v60 }
 0x2f7   : > { %v3281_v63 = vpack.c.bf16 %v3151_v62, %v3151_v62  ;;  %v3410_v0 = vsel %vm3298_vm5, %v3151_v62, 0.0 }
 0x2f8   : > { %3411 = vadd.xlane.f32.xlu1 %v3410_v0 }
 0x2f9   : > { %4832 = vmatmul.msk.bf16.vlgmr.msrb.gmra.mxu2 %vm3298_vm5, %v3281_v63 }
 0x2fc   : > { %v3152_v1 = vpop.f32.mrf.mxu3 }
 0x304   : > { %v6223_v3 = vpop.f32.mrf.mxu3 }
 0x30c   : > { %v3392_v4 = vpop.f32.mrf.mxu3 }
 0x34c   : > { %v2972_v5 = vpop.xlane.xlu0 %2971 }
 0x34d   : > { %v2973_v6 = vsub.f32 %v2966_v41, %v2972_v5  ;;  %v3421_v41 = vlaneseq }
 0x34f   : > { %v2974_v8 = vmul.f32 1.442695, %v2973_v6  ;;  %v3422_v11 = vand.u32 127, %v3421_v41 }
 0x351   : > { %5344 = vpow2.f32 %v2974_v8  ;;  %vm3423_vm12 = vcmp.eq.s32.totalorder %v3422_v11, 3  ;;  %vm3428_vm13 = vcmp.eq.s32.totalorder %v3422_v11, 4 }
 0x357   : > { %v5345_v53 = vpop.eup %5344 }
 0x358   : > { %v2976_v10 = vsel %vm2969_vm0, %v5345_v53, 0.0 }
 0x359   : > { %2977 = vadd.xlane.f32.xlu0 %v2976_v10 }
 0x35b   : > { %v3401_v38 = vpop.xlane.xlu1 %3400 }
 0x367   : > { %v3277_v13 = vpop.f32.mrf.mxu1 }
 0x36b   : > { %v3412_v48 = vpop.xlane.xlu1 %3411 }
 0x36f   : > { %v3279_v14 = vpop.f32.mrf.mxu1 }
 0x37c   : > { %v3311_v15 = vpop.f32.mrf.mxu2 }
 0x384   : > { %v3313_v16 = vpop.f32.mrf.mxu2 }
 0x3cc   : > { %v2978_v21 = vpop.xlane.xlu0 %2977 }
 0x3cd   : > { %5346 = vrcp.f32 %v2978_v21  ;;  %v2990_v24 = vand.u32 2147483648, %v2978_v21  ;;  %v2988_v25 = vand.u32 2147483647, %v2978_v21  ;;  %vm2984_vm7 = vweird.f32 %v2978_v21 }
 0x3ce   : > { %5348 = vrcp.f32 %v5723_v32 }
 0x3cf   : > { %v2991_v28 = vor.u32 1.1754944e-38, %v2990_v24  ;;  %vm2989_vm9 = vcmp.eq.f32.partialorder %v2988_v25, 8.507059e+37  ;;  %5350 = vrcp.f32 %v5724_v33 }
 0x3d3   : > { %v5347_v22 = vpop.eup %5346 }
 0x3d4   : > { %v2980_v23 = vmul.f32 %v5347_v22, %v2978_v21  ;;  %vm2985_vm6 = vweird.f32 %v5347_v22  ;;  %v5349_v34 = vpop.eup %5348 }
 0x3d5   : > { %vm2986_vm8 = vmor %vm2984_vm7, %vm2985_vm6  ;;  %v5351_v49 = vpop.eup %5350  ;;  %v3403_v35 = vmul.f32 128.0, %v5349_v34  ;;  %vm3407_vm10 = vweird.f32 %v5349_v34 }
 0x3d6   : > { %v2981_v7 = vsub.f32 1.0, %v2980_v23  ;;  %v3414_v9 = vmul.f32 32.0, %v5351_v49  ;;  %vm3418_vm11 = vweird.f32 %v5351_v49 }
 0x3d7   : > { %v3404_v36 = vsub.f32 1.0, %v3403_v35 }
 0x3d8   : > { %v2982_v2 = vmul.f32 %v5347_v22, %v2981_v7  ;;  %v3415_v37 = vsub.f32 1.0, %v3414_v9 }
 0x3d9   : > { %v3405_v42 = vmul.f32 %v5349_v34, %v3404_v36 }
 0x3da   : > { %v2983_v27 = vadd.f32 %v5347_v22, %v2982_v2  ;;  %v3416_v39 = vmul.f32 %v5351_v49, %v3415_v37 }
 0x3db   : > { %v3406_v40 = vadd.f32 %v5349_v34, %v3405_v42 }
 0x3dc   : > { %v2987_v29 = vsel %vm2986_vm8, %v5347_v22, %v2983_v27  ;;  %v3417_v43 = vadd.f32 %v5351_v49, %v3416_v39 }
 0x3dd   : > { %v2992_v30 = vsel %vm2989_vm9, %v2991_v28, %v2987_v29  ;;  %v3408_v45 = vsel %vm3407_vm10, %v5349_v34, %v3406_v40 }
 0x3de   : > { %v2993_v26 = vmul.f32 %v5345_v53, %v2992_v30  ;;  %v3419_v47 = vsel %vm3418_vm11, %v5351_v49, %v3417_v43  ;;  %v3409_v52 = vmul.f32 %v3408_v45, %v3401_v38 }
 0x3df   : > { %v3420_v55 = vmul.f32 %v3419_v47, %v3412_v48 }
 0x3e0   : > { %v3171_v31 = vpack.c.bf16 %v2993_v26, %v2993_v26  ;;  %v3426_v57 = vsel %vm3423_vm12, %v3409_v52, 0.0 }
 0x3e1   : > { %v3431_v60 = vsel %vm3428_vm13, %v3420_v55, 0.0 }
 0x3e2   : > { %4791 = vmatmul.msk.bf16.vlgmr.msrb.gmra.mxu0 %vm2969_vm0, %v3171_v31 }
 0x45f   : > { %v3216_v44 = vpop.f32.mrf.mxu0 }
 0x460   : > { %v3278_v46 = vadd.f32 %v3277_v13, %v3216_v44 }
 0x462   : > { %v3315_v50 = vadd.f32 %v3311_v15, %v3278_v46 }
 0x464   : > { %v3394_v54 = vadd.f32 %v6223_v3, %v3315_v50 }
 0x466   : > { %v3399_v56 = vadd.f32 %v5323_v51, %v3394_v54 }
 0x467   : > { %v3218_v58 = vpop.f32.mrf.mxu0 }
 0x468   : > { %v3427_v59 = vadd.f32 %v3426_v57, %v3399_v56 }
 0x46a   : > { %v3432_v61 = vadd.f32 %v3431_v60, %v3427_v59 }
 0x46c   : > { %3433 = vst [vmem:[%s709_s0] sm:$0xff] %v3432_v61 }
 0x46d   : > { %5649 = shalt.err (!%p5646_p8)
}
 0x46e   : > { %5216 = dma.vmem_to_hbm [thread:$0]  (%p5858_p5), %s3448_s29, 128, %s3450_s6, %s3435_s2  }
 0x46f PF: > { %s6324_s20 = sld [smem:[#allocation27_spill]] }
 0x470   : > { %s6325_s18 = sld [smem:[#allocation24_spill]] }
 0x475   : > { %p5268_p9 = scmp.ge.s32.totalorder %s6324_s20, 2 }
 0x476   : > { %s3461_s27 = sand.u32 1, %s6325_s18  }
 0x477   : > { %p5247_p10 = pnand %p5268_p9, %p5862_p6  ;;  %s3462_s24 = scalar_lea.sflag [#allocation4], %s3461_s27 }
 0x479   : > { %p5248_p11 = pneg %p5247_p10 }
 0x47b   : > { %5687 = dma.done.wait (%p5248_p11), %s3462_s24, 128  }
 0x47c   : > { %5689 = vsyncadd (%p5248_p11), %s3462_s24, 4294967168  ;;  %s6327_s30 = sld [smem:[#allocation28_spill]] }
 0x47d   : > { %s6328_s27 = sld [smem:[#allocation25_spill]] }
 0x47e   : > { %s6329_s28 = sld [smem:[#allocation26_spill]] }
 0x47f   : > { %s6330_s29 = sld [smem:[#allocation29_spill]] }
 0x482   : > { %p33_p12 = scmp.ge.s32.totalorder %s6327_s30, 4  }
 0x484   :  { %35 = sbr.rel (!%p33_p12) target bundleno = 16 (0x10), region = 164 }
 0x489   :  { %3468 = vsyncpa [#allocation3], 1 }
 0x48a   :  { %3470 = vsyncpa [#allocation3 + $0x1], 1 }
 0x48b   :  { %3471 = vsyncpa [#allocation6], 1 }
 0x48c   :  { %3472 = vsyncpa [#allocation9], 1 }
 0x48d   :  { %3473 = vsyncpa [#allocation12], 1 }
 0x48e   :  { %3474 = vsyncpa [#allocation15], 1 }
 0x48f   :  { %3475 = vsyncpa [#allocation4], 1 }
 0x490   :  { %3477 = vsyncpa [#allocation4 + $0x1], 1 }

</bundles_post_ra>
